<compile_context>
chip_gen: v7x
topology: tpu7x:2x2x1
jax: 0.10.0
libtpu: 0.0.40
codegen_flags: <defaults>
</compile_context>

<pallas_src>
import jax
import jax.numpy as jnp
from jax.experimental import pallas as pl
from jax.experimental.pallas import tpu as pltpu

NEG_SLOPE = 0.01  # F.leaky_relu default


def _leaky(v):
    return jnp.where(v > 0, v, NEG_SLOPE * v)


def stnet_kernel(
    x_ref,      # (1, FIN, NG)  packed node features, feature-major, f32
    adj_ref,    # (1, NG, NG)   int8 block-diagonal raw adjacency (0/1, symmetric)
    dinv_ref,   # (1, 1, NG)    f32 1/sqrt(1 + deg) per node
    wgcn_ref,   # (H, FIN)      bf16 GCNConv lin weight (torch (out, in) layout)
    wsq_ref,    # (L+1, H, H)   bf16 [GatedGraphConv W[l]^T ..., lin1 weight]
    wgru_ref,   # (2, 3H, H)    bf16 [GRUCell weight_ih, weight_hh], (r, z, n) rows
    bgru_ref,   # (2, 3H, 1)    f32 [b_ih, b_hh] as columns
    bcols_ref,  # (4, H, 1)     f32 [b_gcn, b_lin1, lin2 weight col, b_lin2 bcast]
    out_ref,    # (1, 1, NG)    sigmoid node scores (lane-dense)
    abf_ref,    # scratch (NG, NG) bf16 adjacency: cast once, reused L+1 times
):
    H = wgcn_ref.shape[0]
    num_layers = wsq_ref.shape[0] - 1

    # One int8 -> bf16 cast of the only O(N^2) operand; reused by every
    # adjacency matmul (GCN aggregation + num_layers gated-graph aggregations).
    abf_ref[...] = adj_ref[0].astype(jnp.bfloat16)
    a = abf_ref[...]                 # (NG, NG) bf16, symmetric (undirected graphs)
    dinv = dinv_ref[0]               # (1, NG)  f32
    x = x_ref[0]                     # (FIN, NG) f32

    # Shared weights/biases hoisted out of the unrolled layer loop.
    w_ih = wgru_ref[0]               # (3H, H) bf16
    w_hh = wgru_ref[1]
    b_ih = bgru_ref[0]               # (3H, 1) f32
    b_hh = bgru_ref[1]
    b_gcn = bcols_ref[0]             # (H, 1)
    b_l1 = bcols_ref[1]              # (H, 1)
    w_l2 = bcols_ref[2]              # (H, 1) lin2 weight as a column (kept f32)
    b_l2 = bcols_ref[3][0:1, :]      # (1, 1)

    # ---- conv1: GCNConv with the normalized aggregation rebuilt from A + dinv:
    #   A_norm = D^-1/2 (A+I) D^-1/2  =>  xw @ A_norm = ((xw*dinv)@A + xw*dinv)*dinv
    xw = jnp.dot(wgcn_ref[...], x.astype(jnp.bfloat16),
                 preferred_element_type=jnp.float32)                          # (H, NG)
    xwd = xw * dinv
    agg = jnp.dot(xwd.astype(jnp.bfloat16), a,
                  preferred_element_type=jnp.float32) + xwd                   # (A+I) aggr
    x1 = _leaky(agg * dinv + b_gcn)

    # ---- conv: GatedGraphConv(hidden, num_layers) with GRUCell update --------
    h = x1
    for l in range(num_layers):      # static unroll (small L)
        m = jnp.dot(wsq_ref[l], h.astype(jnp.bfloat16),
                    preferred_element_type=jnp.float32)                       # W[l]^T h
        m = jnp.dot(m.astype(jnp.bfloat16), a,
                    preferred_element_type=jnp.float32)                       # add-aggr
        # Fused GRU gates: 2 matmuls (not 6); torch (r, z, n) row order, slices
        # are 8-aligned on the sublane axis (H multiple of 8).
        gi = jnp.dot(w_ih, m.astype(jnp.bfloat16),
                     preferred_element_type=jnp.float32) + b_ih               # (3H, NG)
        gh = jnp.dot(w_hh, h.astype(jnp.bfloat16),
                     preferred_element_type=jnp.float32) + b_hh
        r = jax.nn.sigmoid(gi[0:H] + gh[0:H])
        z = jax.nn.sigmoid(gi[H:2 * H] + gh[H:2 * H])
        n = jnp.tanh(gi[2 * H:] + r * gh[2 * H:])
        h = (1.0 - z) * n + z * h

    # residual: x2 = leaky_relu(GatedGraphConv(x1)) + x1
    x2 = _leaky(h) + x1

    # ---- lin1 (extension not in ['random_walk','karger','neural'] branch) ----
    x3 = _leaky(jnp.dot(wsq_ref[num_layers], x2.astype(jnp.bfloat16),
                        preferred_element_type=jnp.float32) + b_l1)           # (H, NG)

    # ---- lin2 as a feature (sublane) reduction -> lane-dense (1, NG) result --
    x4 = _leaky(jnp.sum(x3 * w_l2, axis=0, keepdims=True) + b_l2)             # (1, NG)
    out_ref[0] = jax.nn.sigmoid(x4)


def _graphs_per_step(batch, n):
    """Pack G graphs per grid step so the lane axis is >= 128 when possible."""
    g = min(batch, max(1, -(-128 // n)))
    while batch % g:
        g -= 1
    return g


def _vmem_limit_bytes(ng, fin, h, lp1):
    """Explicit scoped-VMEM request derived from NG (review item: the default
    16/32 MiB limit is hit long before physical VMEM at realistic N)."""
    weights = (h * fin + lp1 * h * h + 6 * h * h) * 2 + (6 * h + 4 * h) * 4
    needed = (2 * ng * ng            # int8 adjacency block (double-buffered)
              + 2 * ng * ng          # bf16 adjacency scratch
              + 2 * fin * ng * 4     # features (double-buffered)
              + 4 * ng * 4           # dinv + output blocks
              + 16 * h * ng * 4      # live (H, NG) f32 activations
              + 2 * weights
              + (8 << 20))           # headroom for compiler-internal scratch
    cap = 64 << 20                   # conservative physical floor (v7x)
    try:
        cap = int(getattr(pltpu.get_tpu_info(), "vmem_capacity_bytes", cap))
    except Exception:
        pass
    return int(min(max(needed * 3 // 2, 32 << 20), cap * 7 // 8))


@jax.jit
def stnet_forward(x, a_raw, dinv, packed):
    """Batched STNet node scoring.

    x:      (B, N, FIN) node features (node-major, as in the torch module)
    a_raw:  (B, N, N)   raw 0/1 adjacency (row = dst, col = src); int8 preferred
                        and assumed SYMMETRIC (undirected graphs, as in the module)
    dinv:   (B, N)      1/sqrt(1 + degree)  (replaces the A_norm operand)
    Returns (B, N) sigmoid node scores.
    """
    B, N, FIN = x.shape
    H = packed["w_gcn"].shape[0]
    Lp1 = packed["w_sq"].shape[0]

    if a_raw.dtype != jnp.int8:
        a_raw = a_raw.astype(jnp.int8)   # prefer producing int8 upstream

    G = _graphs_per_step(B, N)
    Bg, NG = B // G, G * N

    # Feature-major packed activations: lane index = graph*N + node (tiny O(N) data).
    x_fm = x.reshape(Bg, G, N, FIN).transpose(0, 3, 1, 2).reshape(Bg, FIN, NG)
    dinv_p = dinv.astype(jnp.float32).reshape(Bg, 1, NG)

    if G == 1:
        a_p = a_raw                       # no packing pre-pass at large N
    else:
        # Disjoint-union (block-diagonal) adjacency of the G packed graphs.
        a_grp = a_raw.reshape(Bg, G, N, N)
        eye_g = jnp.eye(G, dtype=jnp.int8)
        a_p = (a_grp[:, :, None] * eye_g[None, :, :, None, None]
               ).transpose(0, 1, 3, 2, 4).reshape(Bg, NG, NG)

    def resident(*shape):
        # Constant index_map: block is VMEM-resident across the graph-group grid.
        return pl.BlockSpec(shape, lambda b: (0,) * len(shape))

    grid_spec = pltpu.PrefetchScalarGridSpec(
        num_scalar_prefetch=0,
        grid=(Bg,),
        in_specs=[
            pl.BlockSpec((1, FIN, NG), lambda b: (b, 0, 0)),
            pl.BlockSpec((1, NG, NG), lambda b: (b, 0, 0)),
            pl.BlockSpec((1, 1, NG), lambda b: (b, 0, 0)),
            resident(H, FIN),
            resident(Lp1, H, H),
            resident(2, 3 * H, H),
            resident(2, 3 * H, 1),
            resident(4, H, 1),
        ],
        out_specs=pl.BlockSpec((1, 1, NG), lambda b: (b, 0, 0)),
        scratch_shapes=[pltpu.VMEM((NG, NG), jnp.bfloat16)],
    )

    L = Lp1 - 1
    flops = 2 * Bg * (H * FIN * NG + (L + 1) * H * NG * NG
                      + L * 7 * H * H * NG + H * H * NG + H * NG)
    transcendentals = Bg * (3 * L * H * NG + NG)
    bytes_accessed = (Bg * (NG * NG + FIN * NG * 4 + NG * 8)
                      + (H * FIN + Lp1 * H * H + 6 * H * H) * 2
                      + (6 * H + 4 * H) * 4)

    out = pl.pallas_call(
        stnet_kernel,
        out_shape=jax.ShapeDtypeStruct((Bg, 1, NG), jnp.float32),
        grid_spec=grid_spec,
        compiler_params=pltpu.CompilerParams(
            # Graph groups are independent -> shard across TensorCores on v7x.
            dimension_semantics=("parallel",),
            vmem_limit_bytes=_vmem_limit_bytes(NG, FIN, H, Lp1),
        ),
        cost_estimate=pl.CostEstimate(
            flops=int(flops), transcendentals=int(transcendentals),
            bytes_accessed=int(bytes_accessed)),
    )(x_fm, a_p, dinv_p, packed["w_gcn"], packed["w_sq"], packed["w_gru"],
      packed["b_gru"], packed["b_cols"])

    return out.reshape(B, N)


def init_params(key, fin, hidden, num_layers):
    """Parameters in torch-native layouts (GCNConv / GatedGraphConv / GRUCell / Linear)."""
    ks = jax.random.split(key, 11)
    H = hidden

    def u(k, shape, fan_in):
        lim = 1.0 / jnp.sqrt(jnp.float32(fan_in))
        return jax.random.uniform(k, shape, jnp.float32, -lim, lim)

    return {
        "gcn_weight": u(ks[0], (H, fin), fin),            # GCNConv.lin.weight (out, in)
        "gcn_bias": u(ks[1], (H,), H),
        "ggc_weight": u(ks[2], (num_layers, H, H), H),    # used as  m = x @ W[l]
        "gru_w_ih": u(ks[3], (3 * H, H), H),              # rows [W_ir; W_iz; W_in]
        "gru_w_hh": u(ks[4], (3 * H, H), H),
        "gru_b_ih": u(ks[5], (3 * H,), H),
        "gru_b_hh": u(ks[6], (3 * H,), H),
        "lin1_weight": u(ks[7], (H, H), H),               # Linear.weight (out, in)
        "lin1_bias": u(ks[8], (H,), H),
        "lin2_weight": u(ks[9], (1, H), H),
        "lin2_bias": u(ks[10], (1,), H),
    }


def pack_params(p):
    """Pack torch-layout parameters into the 5 weight operands of the kernel.

    Feature-major math uses torch (out, in) weights as-is; only the
    GatedGraphConv weight (applied node-major as x @ W[l]) is transposed.
    Matmul weights are stored bf16 (MXU-native); biases / lin2 column stay f32.
    """
    H = p["gru_w_ih"].shape[0] // 3
    w_sq = jnp.concatenate(
        [jnp.transpose(p["ggc_weight"], (0, 2, 1)),       # W[l]^T for feature-major
         p["lin1_weight"][None]], axis=0).astype(jnp.bfloat16)
    w_gru = jnp.stack([p["gru_w_ih"], p["gru_w_hh"]]).astype(jnp.bfloat16)
    b_gru = jnp.stack([p["gru_b_ih"][:, None], p["gru_b_hh"][:, None]])
    b_cols = jnp.stack([
        p["gcn_bias"][:, None],
        p["lin1_bias"][:, None],
        p["lin2_weight"][0][:, None],
        jnp.full((H, 1), p["lin2_bias"][0], jnp.float32),
    ])
    return {"w_gcn": p["gcn_weight"].astype(jnp.bfloat16), "w_sq": w_sq,
            "w_gru": w_gru, "b_gru": b_gru, "b_cols": b_cols}


@jax.jit
def stnet_reference(x, a_raw, params):
    """Pure-JAX f32 node-major reference of the torch STNet forward (validation)."""
    a = a_raw.astype(jnp.float32)
    n = a.shape[-1]
    dinv = jax.lax.rsqrt(a.sum(axis=-1) + 1.0)
    a_norm = dinv[..., :, None] * (a + jnp.eye(n, dtype=jnp.float32)) * dinv[..., None, :]
    H = params["gru_w_ih"].shape[0] // 3
    L = params["ggc_weight"].shape[0]

    def one(xg, ang, ag):
        x1 = _leaky(ang @ (xg @ params["gcn_weight"].T) + params["gcn_bias"])
        h = x1
        for l in range(L):
            m = ag @ (h @ params["ggc_weight"][l])
            gi = m @ params["gru_w_ih"].T + params["gru_b_ih"]
            gh = h @ params["gru_w_hh"].T + params["gru_b_hh"]
            r = jax.nn.sigmoid(gi[:, :H] + gh[:, :H])
            z = jax.nn.sigmoid(gi[:, H:2 * H] + gh[:, H:2 * H])
            ng = jnp.tanh(gi[:, 2 * H:] + r * gh[:, 2 * H:])
            h = (1.0 - z) * ng + z * h
        x2 = _leaky(h) + x1
        x3 = _leaky(x2 @ params["lin1_weight"].T + params["lin1_bias"])
        x4 = _leaky(x3 @ params["lin2_weight"].T + params["lin2_bias"])
        return jax.nn.sigmoid(x4)[:, 0]

    return jax.vmap(one)(x, a_norm, a)


def level_sets_from_scores(scores):
    """Straight-through level-set construction (forward value only).

    sorted_x, indices = x.sort(descending=True); level_set[i, indices[:i+1]] = 1
    level_sets + x - x.detach() has the same forward value as level_sets.
    Note: for exactly-equal scores tie-breaking may differ from torch.sort.
    """
    n = scores.shape[0]
    order = jnp.argsort(-scores)
    ranks = jnp.zeros((n,), jnp.int32).at[order].set(jnp.arange(n, dtype=jnp.int32))
    row = jnp.arange(n, dtype=jnp.int32)[:, None]
    return (ranks[None, :] <= row).astype(jnp.float32)
    # TODO(synk): `get_set_functions` / `get_extension_functions` (f_sets,
    # min_set_val, loss) are external to the module and not reproducible here.


if __name__ == "__main__":
    B, N, FIN, HIDDEN, NUM_LAYERS = 8, 16, 8, 32, 2  # small demo shapes

    key = jax.random.PRNGKey(0)
    k_x, k_adj, k_par = jax.random.split(key, 3)

    # deterministic random undirected graphs; adjacency produced directly as int8
    # (no wrapper-side cast / transpose pre-pass over the O(N^2) operand).
    r = jax.random.uniform(k_adj, (B, N, N))
    sym = r + jnp.swapaxes(r, 1, 2)
    no_diag = (jnp.eye(N, dtype=jnp.float32) == 0.0)
    a_raw = ((sym < 0.7) & no_diag[None]).astype(jnp.int8)       # (B, N, N) 0/1

    # tiny O(N) operand replacing A_norm: dinv = 1/sqrt(deg(A) + 1)
    dinv = jax.lax.rsqrt(a_raw.astype(jnp.float32).sum(axis=2) + 1.0)  # (B, N)

    x = jax.random.normal(k_x, (B, N, FIN), jnp.float32)         # data.x per graph
    params = init_params(k_par, FIN, HIDDEN, NUM_LAYERS)
    packed = pack_params(params)

    scores = stnet_forward(x, a_raw, dinv, packed)               # (B, N) sigmoid scores
    jax.block_until_ready(scores)

    # validate bf16-MXU / rebuilt-normalization numerics against an f32 reference
    ref = stnet_reference(x, a_raw, params)
    max_err = float(jnp.max(jnp.abs(scores - ref)))

    # per-graph straight-through level sets (forward value)
    level_sets = jax.vmap(level_sets_from_scores)(scores)        # (B, N, N)
    jax.block_until_ready(level_sets)

    assert scores.shape == (B, N)
    assert level_sets.shape == (B, N, N)
    assert bool(jnp.all(jnp.isfinite(scores)))
    assert bool(jnp.all((scores >= 0.0) & (scores <= 1.0)))
    assert max_err < 3e-2, f"kernel vs f32 reference: max abs err {max_err}"
    print("KERNEL_OK")
</pallas_src>

<mosaic_0001>
module attributes {stable_mosaic.version = 11 : i64} {
  func.func @stnet_kernel(%arg0: i32, %arg1: memref<1x8x128xf32, #tpu.memory_space<vmem>>, %arg2: memref<1x128x128xi8, #tpu.memory_space<vmem>>, %arg3: memref<1x1x128xf32, #tpu.memory_space<vmem>>, %arg4: memref<32x8xbf16, #tpu.memory_space<vmem>>, %arg5: memref<3x32x32xbf16, #tpu.memory_space<vmem>>, %arg6: memref<2x96x32xbf16, #tpu.memory_space<vmem>>, %arg7: memref<2x96x1xf32, #tpu.memory_space<vmem>>, %arg8: memref<4x32x1xf32, #tpu.memory_space<vmem>>, %arg9: memref<1x1x128xf32, #tpu.memory_space<vmem>>, %arg10: memref<128x128xbf16, #tpu.memory_space<vmem>>) attributes {dimension_semantics = [#tpu.dimension_semantics<parallel>], iteration_bounds = array<i64: 1>, scalar_prefetch = 0 : i64, scratch_operands = 1 : i64, tpu.core_type = #tpu.core_type<tc>, window_params = [{transform_indices = @transform_0, window_bounds = array<i64: 1, 8, 128>}, {transform_indices = @transform_1, window_bounds = array<i64: 1, 128, 128>}, {transform_indices = @transform_2, window_bounds = array<i64: 1, 1, 128>}, {pipeline_mode = #tpu.pipeline_mode<synchronous>, transform_indices = @transform_3, window_bounds = array<i64: 32, 8>}, {pipeline_mode = #tpu.pipeline_mode<synchronous>, transform_indices = @transform_4, window_bounds = array<i64: 3, 32, 32>}, {pipeline_mode = #tpu.pipeline_mode<synchronous>, transform_indices = @transform_5, window_bounds = array<i64: 2, 96, 32>}, {pipeline_mode = #tpu.pipeline_mode<synchronous>, transform_indices = @transform_6, window_bounds = array<i64: 2, 96, 1>}, {pipeline_mode = #tpu.pipeline_mode<synchronous>, transform_indices = @transform_7, window_bounds = array<i64: 4, 32, 1>}, {transform_indices = @transform_8, window_bounds = array<i64: 1, 1, 128>}]} {
    %c0 = arith.constant 0 : index
    %c0_0 = arith.constant 0 : index
    %c0_1 = arith.constant 0 : index
    %0 = vector.load %arg2[%c0, %c0_0, %c0_1] : memref<1x128x128xi8, #tpu.memory_space<vmem>>, vector<1x128x128xi8>
    %1 = vector.shape_cast %0 : vector<1x128x128xi8> to vector<128x128xi8>
    %2 = arith.sitofp %1 : vector<128x128xi8> to vector<128x128xbf16>
    %c0_2 = arith.constant 0 : index
    %c0_3 = arith.constant 0 : index
    %3 = vector.load %arg10[%c0_2, %c0_3] : memref<128x128xbf16, #tpu.memory_space<vmem>>, vector<128x128xbf16>
    tpu.vector_store %arg10[%c0_2, %c0_3], %2 {strides = array<i32>} : memref<128x128xbf16, #tpu.memory_space<vmem>>, vector<128x128xbf16>,
    %c0_4 = arith.constant 0 : index
    %c0_5 = arith.constant 0 : index
    %4 = vector.load %arg10[%c0_4, %c0_5] : memref<128x128xbf16, #tpu.memory_space<vmem>>, vector<128x128xbf16>
    %c0_6 = arith.constant 0 : index
    %c0_7 = arith.constant 0 : index
    %c0_8 = arith.constant 0 : index
    %5 = vector.load %arg3[%c0_6, %c0_7, %c0_8] : memref<1x1x128xf32, #tpu.memory_space<vmem>>, vector<1x1x128xf32>
    %6 = vector.shape_cast %5 : vector<1x1x128xf32> to vector<1x128xf32>
    %c0_9 = arith.constant 0 : index
    %c0_10 = arith.constant 0 : index
    %c0_11 = arith.constant 0 : index
    %7 = vector.load %arg1[%c0_9, %c0_10, %c0_11] : memref<1x8x128xf32, #tpu.memory_space<vmem>>, vector<1x8x128xf32>
    %8 = vector.shape_cast %7 : vector<1x8x128xf32> to vector<8x128xf32>
    %c0_12 = arith.constant 0 : index
    %c0_13 = arith.constant 0 : index
    %c0_14 = arith.constant 0 : index
    %9 = vector.load %arg6[%c0_12, %c0_13, %c0_14] : memref<2x96x32xbf16, #tpu.memory_space<vmem>>, vector<1x96x32xbf16>
    %10 = vector.shape_cast %9 : vector<1x96x32xbf16> to vector<96x32xbf16>
    %c1 = arith.constant 1 : index
    %c0_15 = arith.constant 0 : index
    %c0_16 = arith.constant 0 : index
    %11 = vector.load %arg6[%c1, %c0_15, %c0_16] : memref<2x96x32xbf16, #tpu.memory_space<vmem>>, vector<1x96x32xbf16>
    %12 = vector.shape_cast %11 : vector<1x96x32xbf16> to vector<96x32xbf16>
    %c0_17 = arith.constant 0 : index
    %c0_18 = arith.constant 0 : index
    %c0_19 = arith.constant 0 : index
    %13 = vector.load %arg7[%c0_17, %c0_18, %c0_19] : memref<2x96x1xf32, #tpu.memory_space<vmem>>, vector<1x96x1xf32>
    %14 = vector.shape_cast %13 : vector<1x96x1xf32> to vector<96x1xf32>
    %c1_20 = arith.constant 1 : index
    %c0_21 = arith.constant 0 : index
    %c0_22 = arith.constant 0 : index
    %15 = vector.load %arg7[%c1_20, %c0_21, %c0_22] : memref<2x96x1xf32, #tpu.memory_space<vmem>>, vector<1x96x1xf32>
    %16 = vector.shape_cast %15 : vector<1x96x1xf32> to vector<96x1xf32>
    %c0_23 = arith.constant 0 : index
    %c0_24 = arith.constant 0 : index
    %c0_25 = arith.constant 0 : index
    %17 = vector.load %arg8[%c0_23, %c0_24, %c0_25] : memref<4x32x1xf32, #tpu.memory_space<vmem>>, vector<1x32x1xf32>
    %18 = vector.shape_cast %17 : vector<1x32x1xf32> to vector<32x1xf32>
    %c1_26 = arith.constant 1 : index
    %c0_27 = arith.constant 0 : index
    %c0_28 = arith.constant 0 : index
    %19 = vector.load %arg8[%c1_26, %c0_27, %c0_28] : memref<4x32x1xf32, #tpu.memory_space<vmem>>, vector<1x32x1xf32>
    %20 = vector.shape_cast %19 : vector<1x32x1xf32> to vector<32x1xf32>
    %c2 = arith.constant 2 : index
    %c0_29 = arith.constant 0 : index
    %c0_30 = arith.constant 0 : index
    %21 = vector.load %arg8[%c2, %c0_29, %c0_30] : memref<4x32x1xf32, #tpu.memory_space<vmem>>, vector<1x32x1xf32>
    %22 = vector.shape_cast %21 : vector<1x32x1xf32> to vector<32x1xf32>
    %c3 = arith.constant 3 : index
    %c0_31 = arith.constant 0 : index
    %c0_32 = arith.constant 0 : index
    %23 = vector.load %arg8[%c3, %c0_31, %c0_32] : memref<4x32x1xf32, #tpu.memory_space<vmem>>, vector<1x32x1xf32>
    %24 = vector.shape_cast %23 : vector<1x32x1xf32> to vector<32x1xf32>
    %25 = vector.extract_strided_slice %24 {offsets = [0, 0], sizes = [1, 1], strides = [1, 1]} : vector<32x1xf32> to vector<1x1xf32>
    %c0_33 = arith.constant 0 : index
    %c0_34 = arith.constant 0 : index
    %26 = vector.load %arg4[%c0_33, %c0_34] : memref<32x8xbf16, #tpu.memory_space<vmem>>, vector<32x8xbf16>
    %27 = arith.truncf %8 : vector<8x128xf32> to vector<8x128xbf16>
    %cst = arith.constant dense<0.000000e+00> : vector<32x128xf32>
    %28 = tpu.matmul %26, %27, %cst {dimension_numbers = #tpu.dot_dimension_numbers<[1], [0], [0], [1], [0, 0, 1, 1], [], []>} : vector<32x8xbf16>, vector<8x128xbf16>, vector<32x128xf32> -> vector<32x128xf32>
    %29 = vector.broadcast %6 : vector<1x128xf32> to vector<32x128xf32>
    %30 = arith.mulf %28, %29 : vector<32x128xf32>
    %31 = arith.truncf %30 : vector<32x128xf32> to vector<32x128xbf16>
    %cst_35 = arith.constant dense<0.000000e+00> : vector<32x128xf32>
    %32 = tpu.matmul %31, %4, %cst_35 {dimension_numbers = #tpu.dot_dimension_numbers<[1], [0], [0], [1], [0, 0, 1, 1], [], []>} : vector<32x128xbf16>, vector<128x128xbf16>, vector<32x128xf32> -> vector<32x128xf32>
    %33 = arith.addf %32, %30 : vector<32x128xf32>
    %34 = vector.broadcast %6 : vector<1x128xf32> to vector<32x128xf32>
    %35 = arith.mulf %33, %34 : vector<32x128xf32>
    %36 = vector.broadcast %18 : vector<32x1xf32> to vector<32x128xf32>
    %37 = arith.addf %35, %36 : vector<32x128xf32>
    %cst_36 = arith.constant 0.000000e+00 : f32
    %38 = vector.broadcast %cst_36 : f32 to vector<32x128xf32>
    %39 = arith.cmpf ogt, %37, %38 : vector<32x128xf32>
    %cst_37 = arith.constant 0.00999999977 : f32
    %40 = vector.broadcast %cst_37 : f32 to vector<32x128xf32>
    %41 = arith.mulf %40, %37 : vector<32x128xf32>
    %42 = arith.select %39, %37, %41 : vector<32x128xi1>, vector<32x128xf32>
    %c0_38 = arith.constant 0 : index
    %c0_39 = arith.constant 0 : index
    %c0_40 = arith.constant 0 : index
    %43 = vector.load %arg5[%c0_38, %c0_39, %c0_40] : memref<3x32x32xbf16, #tpu.memory_space<vmem>>, vector<1x32x32xbf16>
    %44 = vector.shape_cast %43 : vector<1x32x32xbf16> to vector<32x32xbf16>
    %45 = arith.truncf %42 : vector<32x128xf32> to vector<32x128xbf16>
    %cst_41 = arith.constant dense<0.000000e+00> : vector<32x128xf32>
    %46 = tpu.matmul %44, %45, %cst_41 {dimension_numbers = #tpu.dot_dimension_numbers<[1], [0], [0], [1], [0, 0, 1, 1], [], []>} : vector<32x32xbf16>, vector<32x128xbf16>, vector<32x128xf32> -> vector<32x128xf32>
    %47 = arith.truncf %46 : vector<32x128xf32> to vector<32x128xbf16>
    %cst_42 = arith.constant dense<0.000000e+00> : vector<32x128xf32>
    %48 = tpu.matmul %47, %4, %cst_42 {dimension_numbers = #tpu.dot_dimension_numbers<[1], [0], [0], [1], [0, 0, 1, 1], [], []>} : vector<32x128xbf16>, vector<128x128xbf16>, vector<32x128xf32> -> vector<32x128xf32>
    %49 = arith.truncf %48 : vector<32x128xf32> to vector<32x128xbf16>
    %cst_43 = arith.constant dense<0.000000e+00> : vector<96x128xf32>
    %50 = tpu.matmul %10, %49, %cst_43 {dimension_numbers = #tpu.dot_dimension_numbers<[1], [0], [0], [1], [0, 0, 1, 1], [], []>} : vector<96x32xbf16>, vector<32x128xbf16>, vector<96x128xf32> -> vector<96x128xf32>
    %51 = vector.broadcast %14 : vector<96x1xf32> to vector<96x128xf32>
    %52 = arith.addf %50, %51 : vector<96x128xf32>
    %53 = arith.truncf %42 : vector<32x128xf32> to vector<32x128xbf16>
    %cst_44 = arith.constant dense<0.000000e+00> : vector<96x128xf32>
    %54 = tpu.matmul %12, %53, %cst_44 {dimension_numbers = #tpu.dot_dimension_numbers<[1], [0], [0], [1], [0, 0, 1, 1], [], []>} : vector<96x32xbf16>, vector<32x128xbf16>, vector<96x128xf32> -> vector<96x128xf32>
    %55 = vector.broadcast %16 : vector<96x1xf32> to vector<96x128xf32>
    %56 = arith.addf %54, %55 : vector<96x128xf32>
    %57 = vector.extract_strided_slice %52 {offsets = [0, 0], sizes = [32, 128], strides = [1, 1]} : vector<96x128xf32> to vector<32x128xf32>
    %58 = vector.extract_strided_slice %56 {offsets = [0, 0], sizes = [32, 128], strides = [1, 1]} : vector<96x128xf32> to vector<32x128xf32>
    %59 = arith.addf %57, %58 : vector<32x128xf32>
    %60 = arith.negf %59 : vector<32x128xf32>
    %61 = math.exp %60 : vector<32x128xf32>
    %cst_45 = arith.constant 1.000000e+00 : f32
    %62 = vector.broadcast %cst_45 : f32 to vector<32x128xf32>
    %63 = arith.addf %62, %61 : vector<32x128xf32>
    %64 = arith.divf %62, %63 : vector<32x128xf32>
    %65 = vector.extract_strided_slice %52 {offsets = [32, 0], sizes = [32, 128], strides = [1, 1]} : vector<96x128xf32> to vector<32x128xf32>
    %66 = vector.extract_strided_slice %56 {offsets = [32, 0], sizes = [32, 128], strides = [1, 1]} : vector<96x128xf32> to vector<32x128xf32>
    %67 = arith.addf %65, %66 : vector<32x128xf32>
    %68 = arith.negf %67 : vector<32x128xf32>
    %69 = math.exp %68 : vector<32x128xf32>
    %cst_46 = arith.constant 1.000000e+00 : f32
    %70 = vector.broadcast %cst_46 : f32 to vector<32x128xf32>
    %71 = arith.addf %70, %69 : vector<32x128xf32>
    %72 = arith.divf %70, %71 : vector<32x128xf32>
    %73 = vector.extract_strided_slice %52 {offsets = [64, 0], sizes = [32, 128], strides = [1, 1]} : vector<96x128xf32> to vector<32x128xf32>
    %74 = vector.extract_strided_slice %56 {offsets = [64, 0], sizes = [32, 128], strides = [1, 1]} : vector<96x128xf32> to vector<32x128xf32>
    %75 = arith.mulf %64, %74 : vector<32x128xf32>
    %76 = arith.addf %73, %75 : vector<32x128xf32>
    %77 = math.tanh %76 : vector<32x128xf32>
    %cst_47 = arith.constant 1.000000e+00 : f32
    %78 = vector.broadcast %cst_47 : f32 to vector<32x128xf32>
    %79 = arith.subf %78, %72 : vector<32x128xf32>
    %80 = arith.mulf %79, %77 : vector<32x128xf32>
    %81 = arith.mulf %72, %42 : vector<32x128xf32>
    %82 = arith.addf %80, %81 : vector<32x128xf32>
    %c1_48 = arith.constant 1 : index
    %c0_49 = arith.constant 0 : index
    %c0_50 = arith.constant 0 : index
    %83 = vector.load %arg5[%c1_48, %c0_49, %c0_50] : memref<3x32x32xbf16, #tpu.memory_space<vmem>>, vector<1x32x32xbf16>
    %84 = vector.shape_cast %83 : vector<1x32x32xbf16> to vector<32x32xbf16>
    %85 = arith.truncf %82 : vector<32x128xf32> to vector<32x128xbf16>
    %cst_51 = arith.constant dense<0.000000e+00> : vector<32x128xf32>
    %86 = tpu.matmul %84, %85, %cst_51 {dimension_numbers = #tpu.dot_dimension_numbers<[1], [0], [0], [1], [0, 0, 1, 1], [], []>} : vector<32x32xbf16>, vector<32x128xbf16>, vector<32x128xf32> -> vector<32x128xf32>
    %87 = arith.truncf %86 : vector<32x128xf32> to vector<32x128xbf16>
    %cst_52 = arith.constant dense<0.000000e+00> : vector<32x128xf32>
    %88 = tpu.matmul %87, %4, %cst_52 {dimension_numbers = #tpu.dot_dimension_numbers<[1], [0], [0], [1], [0, 0, 1, 1], [], []>} : vector<32x128xbf16>, vector<128x128xbf16>, vector<32x128xf32> -> vector<32x128xf32>
    %89 = arith.truncf %88 : vector<32x128xf32> to vector<32x128xbf16>
    %cst_53 = arith.constant dense<0.000000e+00> : vector<96x128xf32>
    %90 = tpu.matmul %10, %89, %cst_53 {dimension_numbers = #tpu.dot_dimension_numbers<[1], [0], [0], [1], [0, 0, 1, 1], [], []>} : vector<96x32xbf16>, vector<32x128xbf16>, vector<96x128xf32> -> vector<96x128xf32>
    %91 = vector.broadcast %14 : vector<96x1xf32> to vector<96x128xf32>
    %92 = arith.addf %90, %91 : vector<96x128xf32>
    %93 = arith.truncf %82 : vector<32x128xf32> to vector<32x128xbf16>
    %cst_54 = arith.constant dense<0.000000e+00> : vector<96x128xf32>
    %94 = tpu.matmul %12, %93, %cst_54 {dimension_numbers = #tpu.dot_dimension_numbers<[1], [0], [0], [1], [0, 0, 1, 1], [], []>} : vector<96x32xbf16>, vector<32x128xbf16>, vector<96x128xf32> -> vector<96x128xf32>
    %95 = vector.broadcast %16 : vector<96x1xf32> to vector<96x128xf32>
    %96 = arith.addf %94, %95 : vector<96x128xf32>
    %97 = vector.extract_strided_slice %92 {offsets = [0, 0], sizes = [32, 128], strides = [1, 1]} : vector<96x128xf32> to vector<32x128xf32>
    %98 = vector.extract_strided_slice %96 {offsets = [0, 0], sizes = [32, 128], strides = [1, 1]} : vector<96x128xf32> to vector<32x128xf32>
    %99 = arith.addf %97, %98 : vector<32x128xf32>
    %100 = arith.negf %99 : vector<32x128xf32>
    %101 = math.exp %100 : vector<32x128xf32>
    %cst_55 = arith.constant 1.000000e+00 : f32
    %102 = vector.broadcast %cst_55 : f32 to vector<32x128xf32>
    %103 = arith.addf %102, %101 : vector<32x128xf32>
    %104 = arith.divf %102, %103 : vector<32x128xf32>
    %105 = vector.extract_strided_slice %92 {offsets = [32, 0], sizes = [32, 128], strides = [1, 1]} : vector<96x128xf32> to vector<32x128xf32>
    %106 = vector.extract_strided_slice %96 {offsets = [32, 0], sizes = [32, 128], strides = [1, 1]} : vector<96x128xf32> to vector<32x128xf32>
    %107 = arith.addf %105, %106 : vector<32x128xf32>
    %108 = arith.negf %107 : vector<32x128xf32>
    %109 = math.exp %108 : vector<32x128xf32>
    %cst_56 = arith.constant 1.000000e+00 : f32
    %110 = vector.broadcast %cst_56 : f32 to vector<32x128xf32>
    %111 = arith.addf %110, %109 : vector<32x128xf32>
    %112 = arith.divf %110, %111 : vector<32x128xf32>
    %113 = vector.extract_strided_slice %92 {offsets = [64, 0], sizes = [32, 128], strides = [1, 1]} : vector<96x128xf32> to vector<32x128xf32>
    %114 = vector.extract_strided_slice %96 {offsets = [64, 0], sizes = [32, 128], strides = [1, 1]} : vector<96x128xf32> to vector<32x128xf32>
    %115 = arith.mulf %104, %114 : vector<32x128xf32>
    %116 = arith.addf %113, %115 : vector<32x128xf32>
    %117 = math.tanh %116 : vector<32x128xf32>
    %cst_57 = arith.constant 1.000000e+00 : f32
    %118 = vector.broadcast %cst_57 : f32 to vector<32x128xf32>
    %119 = arith.subf %118, %112 : vector<32x128xf32>
    %120 = arith.mulf %119, %117 : vector<32x128xf32>
    %121 = arith.mulf %112, %82 : vector<32x128xf32>
    %122 = arith.addf %120, %121 : vector<32x128xf32>
    %cst_58 = arith.constant 0.000000e+00 : f32
    %123 = vector.broadcast %cst_58 : f32 to vector<32x128xf32>
    %124 = arith.cmpf ogt, %122, %123 : vector<32x128xf32>
    %cst_59 = arith.constant 0.00999999977 : f32
    %125 = vector.broadcast %cst_59 : f32 to vector<32x128xf32>
    %126 = arith.mulf %125, %122 : vector<32x128xf32>
    %127 = arith.select %124, %122, %126 : vector<32x128xi1>, vector<32x128xf32>
    %128 = arith.addf %127, %42 : vector<32x128xf32>
    %c2_60 = arith.constant 2 : index
    %c0_61 = arith.constant 0 : index
    %c0_62 = arith.constant 0 : index
    %129 = vector.load %arg5[%c2_60, %c0_61, %c0_62] : memref<3x32x32xbf16, #tpu.memory_space<vmem>>, vector<1x32x32xbf16>
    %130 = vector.shape_cast %129 : vector<1x32x32xbf16> to vector<32x32xbf16>
    %131 = arith.truncf %128 : vector<32x128xf32> to vector<32x128xbf16>
    %cst_63 = arith.constant dense<0.000000e+00> : vector<32x128xf32>
    %132 = tpu.matmul %130, %131, %cst_63 {dimension_numbers = #tpu.dot_dimension_numbers<[1], [0], [0], [1], [0, 0, 1, 1], [], []>} : vector<32x32xbf16>, vector<32x128xbf16>, vector<32x128xf32> -> vector<32x128xf32>
    %133 = vector.broadcast %20 : vector<32x1xf32> to vector<32x128xf32>
    %134 = arith.addf %132, %133 : vector<32x128xf32>
    %cst_64 = arith.constant 0.000000e+00 : f32
    %135 = vector.broadcast %cst_64 : f32 to vector<32x128xf32>
    %136 = arith.cmpf ogt, %134, %135 : vector<32x128xf32>
    %cst_65 = arith.constant 0.00999999977 : f32
    %137 = vector.broadcast %cst_65 : f32 to vector<32x128xf32>
    %138 = arith.mulf %137, %134 : vector<32x128xf32>
    %139 = arith.select %136, %134, %138 : vector<32x128xi1>, vector<32x128xf32>
    %140 = vector.broadcast %22 : vector<32x1xf32> to vector<32x128xf32>
    %141 = arith.mulf %139, %140 : vector<32x128xf32>
    %cst_66 = arith.constant dense<0.000000e+00> : vector<128xf32>
    %142 = vector.multi_reduction <add>, %141, %cst_66 [0] : vector<32x128xf32> to vector<128xf32>
    %143 = vector.shape_cast %142 : vector<128xf32> to vector<1x128xf32>
    %144 = vector.broadcast %25 : vector<1x1xf32> to vector<1x128xf32>
    %145 = arith.addf %143, %144 : vector<1x128xf32>
    %cst_67 = arith.constant 0.000000e+00 : f32
    %146 = vector.broadcast %cst_67 : f32 to vector<1x128xf32>
    %147 = arith.cmpf ogt, %145, %146 : vector<1x128xf32>
    %cst_68 = arith.constant 0.00999999977 : f32
    %148 = vector.broadcast %cst_68 : f32 to vector<1x128xf32>
    %149 = arith.mulf %148, %145 : vector<1x128xf32>
    %150 = arith.select %147, %145, %149 : vector<1x128xi1>, vector<1x128xf32>
    %151 = arith.negf %150 : vector<1x128xf32>
    %152 = math.exp %151 : vector<1x128xf32>
    %cst_69 = arith.constant 1.000000e+00 : f32
    %153 = vector.broadcast %cst_69 : f32 to vector<1x128xf32>
    %154 = arith.addf %153, %152 : vector<1x128xf32>
    %155 = arith.divf %153, %154 : vector<1x128xf32>
    %c0_70 = arith.constant 0 : index
    %c0_71 = arith.constant 0 : index
    %c0_72 = arith.constant 0 : index
    %156 = vector.load %arg9[%c0_70, %c0_71, %c0_72] : memref<1x1x128xf32, #tpu.memory_space<vmem>>, vector<1x1x128xf32>
    %157 = vector.shape_cast %156 : vector<1x1x128xf32> to vector<1x128xf32>
    %158 = vector.shape_cast %155 : vector<1x128xf32> to vector<1x1x128xf32>
    tpu.vector_store %arg9[%c0_70, %c0_71, %c0_72], %158 {strides = array<i32>} : memref<1x1x128xf32, #tpu.memory_space<vmem>>, vector<1x1x128xf32>,
    return
  }
  func.func @transform_0(%arg0: i32) -> (i32, i32, i32) {
    %c0_i32 = arith.constant 0 : i32
    %c0_i32_0 = arith.constant 0 : i32
    %c0_i32_1 = arith.constant 0 : i32
    return %arg0, %c0_i32, %c0_i32_0 : i32, i32, i32
  }
  func.func @transform_1(%arg0: i32) -> (i32, i32, i32) {
    %c0_i32 = arith.constant 0 : i32
    %c0_i32_0 = arith.constant 0 : i32
    %c0_i32_1 = arith.constant 0 : i32
    return %arg0, %c0_i32, %c0_i32_0 : i32, i32, i32
  }
  func.func @transform_2(%arg0: i32) -> (i32, i32, i32) {
    %c0_i32 = arith.constant 0 : i32
    %c0_i32_0 = arith.constant 0 : i32
    %c0_i32_1 = arith.constant 0 : i32
    return %arg0, %c0_i32, %c0_i32_0 : i32, i32, i32
  }
  func.func @transform_3(%arg0: i32) -> (i32, i32) {
    %c0_i32 = arith.constant 0 : i32
    %c0_i32_0 = arith.constant 0 : i32
    %c0_i32_1 = arith.constant 0 : i32
    return %c0_i32, %c0_i32_0 : i32, i32
  }
  func.func @transform_4(%arg0: i32) -> (i32, i32, i32) {
    %c0_i32 = arith.constant 0 : i32
    %c0_i32_0 = arith.constant 0 : i32
    %c0_i32_1 = arith.constant 0 : i32
    %c0_i32_2 = arith.constant 0 : i32
    return %c0_i32, %c0_i32_0, %c0_i32_1 : i32, i32, i32
  }
  func.func @transform_5(%arg0: i32) -> (i32, i32, i32) {
    %c0_i32 = arith.constant 0 : i32
    %c0_i32_0 = arith.constant 0 : i32
    %c0_i32_1 = arith.constant 0 : i32
    %c0_i32_2 = arith.constant 0 : i32
    return %c0_i32, %c0_i32_0, %c0_i32_1 : i32, i32, i32
  }
  func.func @transform_6(%arg0: i32) -> (i32, i32, i32) {
    %c0_i32 = arith.constant 0 : i32
    %c0_i32_0 = arith.constant 0 : i32
    %c0_i32_1 = arith.constant 0 : i32
    %c0_i32_2 = arith.constant 0 : i32
    return %c0_i32, %c0_i32_0, %c0_i32_1 : i32, i32, i32
  }
  func.func @transform_7(%arg0: i32) -> (i32, i32, i32) {
    %c0_i32 = arith.constant 0 : i32
    %c0_i32_0 = arith.constant 0 : i32
    %c0_i32_1 = arith.constant 0 : i32
    %c0_i32_2 = arith.constant 0 : i32
    return %c0_i32, %c0_i32_0, %c0_i32_1 : i32, i32, i32
  }
  func.func @transform_8(%arg0: i32) -> (i32, i32, i32) {
    %c0_i32 = arith.constant 0 : i32
    %c0_i32_0 = arith.constant 0 : i32
    %c0_i32_1 = arith.constant 0 : i32
    return %arg0, %c0_i32, %c0_i32_0 : i32, i32, i32
  }
}

</mosaic_0001>

<bundles_post_ra>
// kernel: stnet_forward.1
= control target key start
LH: loop header
LB: loop body
LE: loop exit
PB: predicated region body
PF: predicated region fallthrough
CT: control target
= control target key end

     0   :  { %vm148_vm0 = vcmask 1043456   ;;  %vm141_vm1 = vcmask 64512   ;;  %v1935_v17 = vmov 0   ;;  %vm318_vm2 = vcmask 261120   ;;  %s2467_s0 = inlined_call_operand.vmem [shape: f32[1,8,128], index: 0, kind: input, shape index: {}]   ;;  %s2468_s3 = inlined_call_operand.vmem [shape: bf16[32,8], index: 3, kind: input, shape index: {}]   ;;  %s2469_s1 = inlined_call_operand.vmem [shape: s8[1,128,128], index: 1, kind: input, shape index: {}]   ;;  %s2470_s7 = inlined_call_operand.vmem [shape: f32[4,32,1], index: 7, kind: input, shape index: {}]   ;;  %s2471_s6 = inlined_call_operand.vmem [shape: f32[2,96,1], index: 6, kind: input, shape index: {}]   ;;  %s2472_s2 = inlined_call_operand.vmem [shape: f32[1,1,128], index: 2, kind: input, shape index: {}]   ;;  %s2473_s4 = inlined_call_operand.vmem [shape: bf16[3,32,32], index: 4, kind: input, shape index: {}]   ;;  %s2474_s5 = inlined_call_operand.vmem [shape: bf16[2,96,32], index: 5, kind: input, shape index: {}]   ;;  %s2475_s8 = inlined_call_operand.vmem [shape: f32[1,1,128], index: 8, kind: output, shape index: {}]  }
   0x1   :  { %v59_v0 = vld [vmem:[%s2467_s0] sm:$0xff]  ;;  %v1832_v5 = vld [vmem:[%s2468_s3 + $0x8] sm:$0xff]   ;;  %v32_v11 = vld [vmem:[%s2469_s1 + $0x10] sm:$0xff]  ;;  %1829 = vset.pattern.permute.xlu0 %v1935_v17  ;;  %1830 = vset.pattern.permute.xlu1 %v1935_v17 }
   0x2   :  { %v130_v1 = vpack.c.bf16 %v59_v0, %v59_v0  ;;  %v1831_v2 = vld [vmem:[%s2468_s3] sm:$0xff]   ;;  %v31_v8 = vld [vmem:[%s2469_s1 + $0x8] sm:$0xff]  ;;  %v2014_v12 = vunpack.c.l.s8.bf16 %v32_v11  ;;  %v2018_v13 = vunpack.c.h.s8.bf16 %v32_v11  ;;  %v33_v14 = vld [vmem:[%s2469_s1 + $0x18] sm:$0xff] }
   0x3   :  { %v30_v3 = vld [vmem:[%s2469_s1] sm:$0xff]  ;;  %1623 = vmatprep.mubr.msk.bf16.mxu0 %vm141_vm1, %v1831_v2  ;;  %v2003_v9 = vunpack.c.l.s8.bf16 %v31_v8  ;;  %v2007_v10 = vunpack.c.h.s8.bf16 %v31_v8  ;;  %v2026_v15 = vunpack.c.l.s8.bf16 %v33_v14  ;;  %v2030_v16 = vunpack.c.h.s8.bf16 %v33_v14  ;;  %v112_v19 = vld [vmem:[%s2470_s7 + $0x10] sm:$0xff]  ;;  %v111_v20 = vld [vmem:[%s2470_s7 + $0x8] sm:$0xff] }
   0x4   :  { %1827 = vmatprep.subr.msk.bf16.mxu0 %vm148_vm0, %v130_v1  ;;  %v150_v4 = vsel %vm148_vm0, %v130_v1, 0  ;;  %v1993_v6 = vunpack.c.l.s8.bf16 %v30_v3  ;;  %v1995_v7 = vunpack.c.h.s8.bf16 %v30_v3  ;;  %v110_v18 = vld [vmem:[%s2470_s7] sm:$0xff]  ;;  %278 = vperm.xlu1 %1830, %v112_v19   ;;  %v113_v21 = vld [vmem:[%s2470_s7 + $0x18] sm:$0xff]  ;;  %v86_v23 = vld [vmem:[%s2471_s6 + $0x8] sm:$0xff] }
   0x5   :  { %1622 = vmatpush3.bf16.msra.mxu0 %v150_v4  ;;  %268 = vperm.xlu0 %1829, %v110_v18   ;;  %v85_v22 = vld [vmem:[%s2471_s6] sm:$0xff]  ;;  %v1446_v25 = vld [vmem:[%s2471_s6 + $0x68] sm:$0xff]  ;;  %v87_v26 = vld [vmem:[%s2471_s6 + $0x10] sm:$0xff] }
   0x6   :  { %1627 = vmatprep.subr.bf16.mxu1 %v1993_v6  ;;  %v1445_v24 = vld [vmem:[%s2471_s6 + $0x60] sm:$0xff]  ;;  %v88_v27 = vld [vmem:[%s2471_s6 + $0x18] sm:$0xff]  ;;  %v1447_v28 = vld [vmem:[%s2471_s6 + $0x70] sm:$0xff] }
   0x7   :  { %1628 = vmatpush3.bf16.msra.mxu1 %v1993_v6  ;;  %v1448_v29 = vld [vmem:[%s2471_s6 + $0x78] sm:$0xff]  ;;  %v89_v30 = vld [vmem:[%s2471_s6 + $0x20] sm:$0xff]  ;;  %v90_v31 = vld [vmem:[%s2471_s6 + $0x28] sm:$0xff] }
   0x8   :  { %1624 = vmatmul.mubr.msk.bf16.vlgmr.msra.gmra.mrb[0].mxu0 %vm141_vm1, %v1832_v5  ;;  %1629 = vmatprep.subr.bf16.mxu1 %v1995_v7  ;;  %v1449_v32 = vld [vmem:[%s2471_s6 + $0x80] sm:$0xff]  ;;  %v1450_v33 = vld [vmem:[%s2471_s6 + $0x88] sm:$0xff]  ;;  %v91_v34 = vld [vmem:[%s2471_s6 + $0x30] sm:$0xff] }
   0x9   :  { %273 = vperm.xlu0 %1829, %v111_v20   ;;  %283 = vperm.xlu1 %1830, %v113_v21   ;;  %v92_v35 = vld [vmem:[%s2471_s6 + $0x38] sm:$0xff]  ;;  %v1451_v36 = vld [vmem:[%s2471_s6 + $0x90] sm:$0xff]  ;;  %v1453_v38 = vld [vmem:[%s2471_s6 + $0xa0] sm:$0xff] }
   0xa   :  { %v1452_v37 = vld [vmem:[%s2471_s6 + $0x98] sm:$0xff]  ;;  %v1454_v39 = vld [vmem:[%s2471_s6 + $0xa8] sm:$0xff]  ;;  %v93_v40 = vld [vmem:[%s2471_s6 + $0x40] sm:$0xff] }
   0xb   :  { %1630 = vmatpush3.bf16.msra.mxu1 %v1995_v7  ;;  %v94_v41 = vld [vmem:[%s2471_s6 + $0x48] sm:$0xff]  ;;  %v1455_v42 = vld [vmem:[%s2471_s6 + $0xb0] sm:$0xff]  ;;  %v1456_v43 = vld [vmem:[%s2471_s6 + $0xb8] sm:$0xff] }
   0xc   :  { %1631 = vmatprep.subr.bf16.mxu1 %v2003_v9  ;;  %v95_v44 = vld [vmem:[%s2471_s6 + $0x50] sm:$0xff]  ;;  %v96_v45 = vld [vmem:[%s2471_s6 + $0x58] sm:$0xff]  ;;  %v1457_v46 = vld [vmem:[%s2470_s7 + $0x20] sm:$0xff] }
   0xd   :  { %429 = vperm.xlu0 %1829, %v85_v22   ;;  %434 = vperm.xlu1 %1830, %v86_v23   ;;  %v1458_v47 = vld [vmem:[%s2470_s7 + $0x28] sm:$0xff]  ;;  %v1459_v48 = vld [vmem:[%s2470_s7 + $0x30] sm:$0xff]  ;;  %v1460_v49 = vld [vmem:[%s2470_s7 + $0x38] sm:$0xff] }
   0xe   :  { %v1461_v50 = vld [vmem:[%s2470_s7 + $0x40] sm:$0xff]  ;;  %v1462_v51 = vld [vmem:[%s2470_s7 + $0x48] sm:$0xff]  ;;  %v1463_v52 = vld [vmem:[%s2470_s7 + $0x50] sm:$0xff] }
   0xf   :  { %1632 = vmatpush3.bf16.msra.mxu1 %v2003_v9  ;;  %v1464_v53 = vld [vmem:[%s2470_s7 + $0x58] sm:$0xff]  ;;  %v1465_v54 = vld [vmem:[%s2470_s7 + $0x60] sm:$0xff] }
  0x10   :  { %1633 = vmatprep.subr.bf16.mxu1 %v2007_v10  ;;  %v1470_v56 = vld [vmem:[%s2472_s2] ss:$0 sm:$0xff] }
  0x11   :  { %618 = vperm.xlu0 %1829, %v1445_v24   ;;  %623 = vperm.xlu1 %1830, %v1446_v25   ;;  %v1833_v2 = vld [vmem:[%s2473_s4] sm:$0xff]  }
  0x12   :  { %1651 = vmatprep.mubr.msk.bf16.mxu0 %vm318_vm2, %v1833_v2  ;;  %v1847_v2 = vld [vmem:[%s2473_s4 + $0x10] sm:$0xff]  }
  0x13   :  { %1634 = vmatpush3.bf16.msra.mxu1 %v2007_v10 }
  0x14   :  { %1635 = vmatprep.subr.bf16.mxu1 %v2014_v12 }
  0x15   :  { %439 = vperm.xlu0 %1829, %v87_v26   ;;  %444 = vperm.xlu1 %1830, %v88_v27  }
  0x17   :  { %1636 = vmatpush3.bf16.msra.mxu1 %v2014_v12 }
  0x18   :  { %1637 = vmatprep.subr.bf16.mxu1 %v2018_v13 }
  0x19   :  { %628 = vperm.xlu0 %1829, %v1447_v28   ;;  %633 = vperm.xlu1 %1830, %v1448_v29  }
  0x1b   :  { %1638 = vmatpush3.bf16.msra.mxu1 %v2018_v13 }
  0x1c   :  { %1639 = vmatprep.subr.bf16.mxu1 %v2026_v15 }
  0x1d   :  { %449 = vperm.xlu0 %1829, %v89_v30   ;;  %454 = vperm.xlu1 %1830, %v90_v31  }
  0x1f   :  { %1640 = vmatpush3.bf16.msra.mxu1 %v2026_v15 }
  0x20   :  { %1641 = vmatprep.subr.bf16.mxu1 %v2030_v16 }
  0x21   :  { %638 = vperm.xlu0 %1829, %v1449_v32   ;;  %643 = vperm.xlu1 %1830, %v1450_v33  }
  0x23   :  { %1642 = vmatpush3.bf16.msra.mxu1 %v2030_v16 }
  0x25   :  { %459 = vperm.xlu0 %1829, %v91_v34   ;;  %464 = vperm.xlu1 %1830, %v92_v35  }
  0x29   :  { %648 = vperm.xlu0 %1829, %v1451_v36   ;;  %653 = vperm.xlu1 %1830, %v1452_v37  }
  0x2d   :  { %658 = vperm.xlu0 %1829, %v1453_v38   ;;  %663 = vperm.xlu1 %1830, %v1454_v39  }
  0x31   :  { %469 = vperm.xlu0 %1829, %v93_v40   ;;  %474 = vperm.xlu1 %1830, %v94_v41   ;;  %v1834_v41 = vld [vmem:[%s2473_s4 + $0x8] sm:$0xff]  }
  0x35   :  { %668 = vperm.xlu0 %1829, %v1455_v42   ;;  %673 = vperm.xlu1 %1830, %v1456_v43  }
  0x39   :  { %479 = vperm.xlu0 %1829, %v95_v44   ;;  %484 = vperm.xlu1 %1830, %v96_v45  }
  0x3d   :  { %1285 = vperm.xlu0 %1829, %v1457_v46   ;;  %1290 = vperm.xlu1 %1830, %v1458_v47  }
  0x41   :  { %1295 = vperm.xlu0 %1829, %v1459_v48   ;;  %1300 = vperm.xlu1 %1830, %v1460_v49   ;;  %v1835_v48 = vld [vmem:[%s2474_s5] sm:$0xff]  }
  0x42   :  { %v2190_v49 = vld [vmem:[%s2474_s5 + $0x20] sm:$0xff]  }
  0x45   :  { %1382 = vperm.xlu0 %1829, %v1461_v50   ;;  %1387 = vperm.xlu1 %1830, %v1462_v51  }
  0x49   :  { %1392 = vperm.xlu0 %1829, %v1463_v52   ;;  %1397 = vperm.xlu1 %1830, %v1464_v53  }
  0x4d   :  { %1415 = vperm.xlu0 %1829, %v1465_v54  }
  0x83   :  { %v279_v3 = vpop.permute.xlu1 %278 }
  0x84   :  { %v269_v5 = vpop.permute.xlu0 %268 }
  0x88   :  { %v284_v24 = vpop.permute.xlu1 %283  ;;  %v274_v28 = vpop.permute.xlu0 %273 }
  0xdb   :  { %v1625_v55 = vpop.f32.mrb[0].mxu0 }
  0xdc   :  { %v186_v57 = vpop.f32.mrb[1].mxu0  ;;  %v209_v63 = vmul.f32 %v1625_v55, %v1470_v56 }
  0xdd   :  { %v1626_v58 = vpop.f32.mrb[2].mxu0  ;;  %v207_v61 = vmul.f32 %v1470_v56, %v186_v57  ;;  %v2203_v57 = vld [vmem:[%s2474_s5 + $0x28] sm:$0xff]  }
  0xde   :  { %v210_v59 = vmul.f32 %v1626_v58, %v1470_v56  ;;  %v189_v60 = vpop.f32.mrb[3].mxu0  ;;  %v2208_v58 = vld [vmem:[%s2474_s5 + $0x10] sm:$0xff]  }
  0xdf   :  { %v208_v62 = vmul.f32 %v1470_v56, %v189_v60  ;;  %v2226_v60 = vld [vmem:[%s2474_s5 + $0x18] sm:$0xff]  }
  0xe0   :  { %v212_v1 = vpack.c.bf16 %v210_v59, %v209_v63 }
  0xe1   :  { %v211_v0 = vpack.c.bf16 %v208_v62, %v207_v61 }
  0xe3   :  { %1643 = vmatprep.mubr.bf16.mxu1 %v211_v0  ;;  %v2252_v0 = vld [vmem:[%s2474_s5 + $0x50] sm:$0xff]  }
  0xe4   :  { %1644 = vmatmul.mubr.bf16.vlgmr.msra.gmra.mrb[0].mxu1 %v212_v1  ;;  %v2261_v1 = vld [vmem:[%s2474_s5 + $0x58] sm:$0xff]  }
  0xe5   :  { %1687 = vmatprep.mubr.msk.bf16.mxu1 %vm318_vm2, %v2190_v49 }
 0x1b7   :  { %v1645_v4 = vpop.f32.mrb[0].mxu1 }
 0x1b8   :  { %v256_v8 = vadd.f32 %v1645_v4, %v209_v63  ;;  %v247_v11 = vpop.f32.mrb[1].mxu1  ;;  %v2247_v63 = vld [vmem:[%s2474_s5 + $0x48] sm:$0xff]   ;;  %v2272_v4 = vpop.permute.xlu1 %434 }
 0x1b9   :  { %v248_v14 = vadd.f32 %v247_v11, %v207_v61  ;;  %v1646_v17 = vpop.f32.mrb[2].mxu1  ;;  %v2231_v61 = vld [vmem:[%s2474_s5 + $0x38] sm:$0xff]  }
 0x1ba   :  { %v264_v18 = vmul.f32 %v1470_v56, %v256_v8  ;;  %v259_v19 = vadd.f32 %v1646_v17, %v210_v59  ;;  %v250_v20 = vpop.f32.mrb[3].mxu1  ;;  %v2213_v59 = vld [vmem:[%s2474_s5 + $0x30] sm:$0xff]  }
 0x1bb   :  { %v262_v21 = vmul.f32 %v1470_v56, %v248_v14  ;;  %v251_v22 = vadd.f32 %v250_v20, %v208_v62  ;;  %v2236_v62 = vld [vmem:[%s2474_s5 + $0x40] sm:$0xff]  }
 0x1bc   :  { %v265_v23 = vmul.f32 %v1470_v56, %v259_v19  ;;  %v288_v25 = vadd.f32 %v279_v3, %v264_v18  ;;  %v2270_v3 = vpop.permute.xlu0 %429  ;;  %v2276_v8 = vpop.permute.xlu1 %623 }
 0x1bd   :  { %v286_v26 = vadd.f32 %v269_v5, %v262_v21  ;;  %v263_v27 = vmul.f32 %v1470_v56, %v251_v22  ;;  %v2198_v56 = vld [vmem:[%s2474_s5 + $0x8] sm:$0xff]  }
 0x1be   :  { %v289_v29 = vadd.f32 %v284_v24, %v265_v23  ;;  %v296_v33 = vmul.f32 0.01, %v288_v25  ;;  %vm292_vm6 = vcmp.gt.f32.partialorder %v288_v25, 0.0 }
 0x1bf   :  { %v294_v30 = vmul.f32 0.01, %v286_v26  ;;  %v287_v31 = vadd.f32 %v274_v28, %v263_v27  ;;  %vm290_vm3 = vcmp.gt.f32.partialorder %v286_v26, 0.0 }
 0x1c0   :  { %vm293_vm4 = vcmp.gt.f32.partialorder %v289_v29, 0.0  ;;  %v297_v32 = vmul.f32 0.01, %v289_v29  ;;  %v2160_v39 = vsel %vm292_vm6, %v288_v25, %v296_v33  ;;  %v2274_v5 = vpop.permute.xlu0 %618  ;;  %v2280_v14 = vpop.permute.xlu1 %444 }
 0x1c1   :  { %vm291_vm5 = vcmp.gt.f32.partialorder %v287_v31, 0.0  ;;  %v295_v34 = vmul.f32 0.01, %v287_v31  ;;  %v2152_v35 = vsel %vm290_vm3, %v286_v26, %v294_v30 }
 0x1c2   :  { %v2154_v36 = vsel %vm293_vm4, %v289_v29, %v297_v32 }
 0x1c3   :  { %v2156_v37 = vsel %vm291_vm5, %v287_v31, %v295_v34  ;;  %v307_v40 = vpack.c.bf16 %v2154_v36, %v2160_v39 }
 0x1c4   :  { %v306_v38 = vpack.c.bf16 %v2156_v37, %v2152_v35  ;;  %v2278_v11 = vpop.permute.xlu0 %439  ;;  %v2284_v18 = vpop.permute.xlu1 %633 }
 0x1c6   :  { %1647 = vmatprep.subr.bf16.mxu0 %v306_v38 }
 0x1c7   :  { %1648 = vmatpush3.bf16.msra.mxu0 %v306_v38 }
 0x1c8   :  { %1649 = vmatprep.subr.bf16.mxu0 %v307_v40  ;;  %v2282_v17 = vpop.permute.xlu0 %628  ;;  %v2288_v20 = vpop.permute.xlu1 %454 }
 0x1c9   :  { %2484 = vst [vmem:[#allocation4_spill] sm:$0xff] %v2288_v20 }
 0x1cb   :  { %1650 = vmatpush3.bf16.msra.mxu0 %v307_v40 }
 0x1cc   :  { %1655 = vmatprep.subr.bf16.mxu0 %v1993_v6  ;;  %v2286_v19 = vpop.permute.xlu0 %449  ;;  %v2292_v22 = vpop.permute.xlu1 %643 }
 0x1cd   :  { %2483 = vst [vmem:[#allocation3_spill] sm:$0xff] %v2286_v19  ;;  %2486 = vst [vmem:[#allocation6_spill] sm:$0xff] %v2292_v22 }
 0x1ce   :  { %1652 = vmatmul.mubr.msk.bf16.vlgmr.msra.gmra.mrb[4].mxu0 %vm318_vm2, %v1834_v41 }
 0x1cf   :  { %1656 = vmatpush3.bf16.msra.mxu0 %v1993_v6 }
 0x1d0   :  { %1657 = vmatprep.subr.bf16.mxu0 %v1995_v7  ;;  %v2290_v21 = vpop.permute.xlu0 %638 }
 0x1d1   :  { %2485 = vst [vmem:[#allocation5_spill] sm:$0xff] %v2290_v21 }
 0x1d3   :  { %1658 = vmatpush3.bf16.msra.mxu0 %v1995_v7 }
 0x1d4   :  { %1659 = vmatprep.subr.bf16.mxu0 %v2003_v9  ;;  %v2305_v34 = vpop.permute.xlu0 %459 }
 0x1d7   :  { %1660 = vmatpush3.bf16.msra.mxu0 %v2003_v9 }
 0x1d8   :  { %1661 = vmatprep.subr.bf16.mxu0 %v2007_v10 }
 0x1db   :  { %1662 = vmatpush3.bf16.msra.mxu0 %v2007_v10 }
 0x1dc   :  { %1663 = vmatprep.subr.bf16.mxu0 %v2014_v12 }
 0x1df   :  { %1664 = vmatpush3.bf16.msra.mxu0 %v2014_v12 }
 0x1e0   :  { %1665 = vmatprep.subr.bf16.mxu0 %v2018_v13 }
 0x1e3   :  { %1666 = vmatpush3.bf16.msra.mxu0 %v2018_v13 }
 0x1e4   :  { %1667 = vmatprep.subr.bf16.mxu0 %v2026_v15 }
 0x1e7   :  { %1668 = vmatpush3.bf16.msra.mxu0 %v2026_v15 }
 0x1e8   :  { %1669 = vmatprep.subr.bf16.mxu0 %v2030_v16 }
 0x1eb   :  { %1670 = vmatpush3.bf16.msra.mxu0 %v2030_v16 }
 0x2a1   :  { %v1653_v42 = vpop.f32.mrb[4].mxu0 }
 0x2a2   :  { %v359_v43 = vpop.f32.mrb[5].mxu0 }
 0x2a3   :  { %v1654_v44 = vpop.f32.mrb[6].mxu0 }
 0x2a4   :  { %v375_v45 = vpack.c.bf16 %v1654_v44, %v1653_v42  ;;  %v362_v46 = vpop.f32.mrb[7].mxu0 }
 0x2a5   :  { %v374_v47 = vpack.c.bf16 %v362_v46, %v359_v43 }
 0x2a7   :  { %1671 = vmatprep.mubr.bf16.mxu0 %v374_v47 }
 0x2a8   :  { %1672 = vmatmul.mubr.bf16.vlgmr.msra.gmra.mrb[8].mxu0 %v375_v45 }
 0x2a9   :  { %1679 = vmatprep.mubr.msk.bf16.mxu0 %vm318_vm2, %v1835_v48 }
 0x37b   :  { %v1673_v50 = vpop.f32.mrb[8].mxu0 }
 0x37c   :  { %v410_v51 = vpop.f32.mrb[9].mxu0 }
 0x37d   :  { %v1674_v52 = vpop.f32.mrb[10].mxu0 }
 0x37e   :  { %v426_v53 = vpack.c.bf16 %v1674_v52, %v1673_v50  ;;  %v413_v54 = vpop.f32.mrb[11].mxu0 }
 0x37f   :  { %v425_v55 = vpack.c.bf16 %v413_v54, %v410_v51 }
 0x381   :  { %1675 = vmatprep.subr.bf16.mxu0 %v425_v55  ;;  %1775 = vmatprep.subr.bf16.mxu1 %v425_v55 }
 0x382   :  { %1676 = vmatpush3.bf16.msra.mxu0 %v425_v55  ;;  %1777 = vmatpush3.bf16.msra.mxu1 %v425_v55 }
 0x383   :  { %1677 = vmatprep.subr.bf16.mxu0 %v426_v53  ;;  %1776 = vmatprep.subr.bf16.mxu1 %v426_v53 }
 0x386   :  { %1678 = vmatpush3.bf16.msra.mxu0 %v426_v53  ;;  %1778 = vmatpush3.bf16.msra.mxu1 %v426_v53 }
 0x387   :  { %1691 = vmatprep.subr.bf16.mxu1 %v306_v38 }
 0x389   :  { %1680 = vmatmul.mubr.msk.bf16.vlgmr.msra.gmra.mrb[12].mxu0 %vm318_vm2, %v2198_v56  ;;  %1688 = vmatmul.mubr.msk.bf16.vlgmr.msra.gmra.mrb[4].mxu1 %vm318_vm2, %v2203_v57 }
 0x38a   :  { %1692 = vmatpush3.bf16.msra.mxu1 %v306_v38  ;;  %1683 = vmatprep.mubr.msk.bf16.mxu0 %vm318_vm2, %v2208_v58 }
 0x38b   :  { %1693 = vmatprep.subr.bf16.mxu1 %v307_v40  ;;  %1695 = vmatprep.mubr.msk.bf16.mxu1 %vm318_vm2, %v2213_v59 }
 0x38e   :  { %1694 = vmatpush3.bf16.msra.mxu1 %v307_v40  ;;  %v2308_v40 = vpop.permute.xlu1 %464 }
 0x38f   :  { %2487 = vst [vmem:[#allocation7_spill] sm:$0xff] %v2308_v40 }
 0x391   :  { %1684 = vmatmul.mubr.msk.bf16.gmra.mrb[16].mxu0 %vm318_vm2, %v2226_v60  ;;  %1696 = vmatmul.mubr.msk.bf16.vlgmr.msra.gmra.mrb[8].mxu1 %vm318_vm2, %v2231_v61 }
 0x392   :  { %1699 = vmatprep.mubr.msk.bf16.mxu1 %vm318_vm2, %v2236_v62  ;;  %1711 = vmatprep.mubr.msk.bf16.mxu0 %vm318_vm2, %v1847_v2 }
 0x399   :  { %1700 = vmatmul.mubr.msk.bf16.gmra.mrb[12].mxu1 %vm318_vm2, %v2247_v63 }
 0x39a   :  { %1703 = vmatprep.mubr.msk.bf16.mxu1 %vm318_vm2, %v2252_v0 }
 0x3a1   :  { %1704 = vmatmul.mubr.msk.bf16.gmra.mrb[16].mxu1 %vm318_vm2, %v2261_v1 }
 0x3a2   :  { %1739 = vmatprep.mubr.msk.bf16.mxu1 %vm318_vm2, %v1835_v48 }
 0x45c   :  { %v1681_v23 = vpop.f32.mrb[12].mxu0  ;;  %v2294_v24 = vpop.f32.mrb[4].mxu1 }
 0x45d   :  { %v569_v25 = vpop.f32.mrb[13].mxu0  ;;  %v2296_v26 = vpop.f32.mrb[5].mxu1  ;;  %v578_v29 = vadd.f32 %v1681_v23, %v2278_v11 }
 0x45e   :  { %v1682_v27 = vpop.f32.mrb[14].mxu0  ;;  %v2298_v28 = vpop.f32.mrb[6].mxu1  ;;  %v570_v32 = vadd.f32 %v569_v25, %v2270_v3 }
 0x45f   :  { %v572_v30 = vpop.f32.mrb[15].mxu0  ;;  %v2301_v31 = vpop.f32.mrb[7].mxu1  ;;  %v581_v33 = vadd.f32 %v1682_v27, %v2280_v14  ;;  %v1780_v41 = vadd.f32 %v2282_v17, %v578_v29 }
 0x460   :  { %v573_v38 = vadd.f32 %v572_v30, %v2272_v4  ;;  %v1783_v44 = vadd.f32 %v2274_v5, %v570_v32  ;;  %v2315_v27 = vpop.permute.xlu0 %648 }
 0x461   :  { %v1786_v48 = vadd.f32 %v2284_v18, %v581_v33 }
 0x462   :  { %v1789_v53 = vadd.f32 %v2276_v8, %v573_v38 }
 0x464   :  { %v1685_v42 = vpop.f32.mrb[16].mxu0  ;;  %v1697_v43 = vpop.f32.mrb[8].mxu1 }
 0x465   :  { %v1781_v45 = vadd.f32 %v1780_v41, %v1697_v43  ;;  %v585_v46 = vpop.f32.mrb[17].mxu0  ;;  %v758_v47 = vpop.f32.mrb[9].mxu1  ;;  %v594_v54 = vadd.f32 %v1685_v42, %v2305_v34 }
 0x466   :  { %v1784_v50 = vadd.f32 %v1783_v44, %v758_v47  ;;  %v1686_v51 = vpop.f32.mrb[18].mxu0  ;;  %v1698_v52 = vpop.f32.mrb[10].mxu1  ;;  %v586_v29 = vadd.f32 %v585_v46, %v2286_v19 }
 0x467   :  { %v1501_v55 = vmul.f32 -1.442695, %v1781_v45  ;;  %v1787_v2 = vadd.f32 %v1786_v48, %v1698_v52  ;;  %v588_v23 = vpop.f32.mrb[19].mxu0  ;;  %v761_v25 = vpop.f32.mrb[11].mxu1  ;;  %v597_v33 = vadd.f32 %v1686_v51, %v2308_v40  ;;  %v1792_v44 = vadd.f32 %v2315_v27, %v594_v54 }
 0x468   :  { %v1499_v30 = vmul.f32 -1.442695, %v1784_v50  ;;  %v1790_v32 = vadd.f32 %v1789_v53, %v761_v25  ;;  %v2319_v43 = vpop.permute.xlu1 %653  ;;  %v589_v38 = vadd.f32 %v588_v23, %v2288_v20  ;;  %v1795_v47 = vadd.f32 %v2290_v21, %v586_v29  ;;  %v2325_v52 = vpop.permute.xlu0 %658 }
 0x469   :  { %1851 = vpow2.f32 %v1501_v55  ;;  %v1502_v41 = vmul.f32 -1.442695, %v1787_v2  ;;  %2488 = vst [vmem:[#allocation8_spill] sm:$0xff] %v2319_v43  ;;  %v1798_v50 = vadd.f32 %v2319_v43, %v597_v33 }
 0x46a   :  { %1853 = vpow2.f32 %v1499_v30  ;;  %v1500_v42 = vmul.f32 -1.442695, %v1790_v32  ;;  %v1801_v55 = vadd.f32 %v2292_v22, %v589_v38 }
 0x46b   :  { %1855 = vpow2.f32 %v1502_v41 }
 0x46c   :  { %1857 = vpow2.f32 %v1500_v42  ;;  %v1701_v45 = vpop.f32.mrb[12].mxu1  ;;  %v2328_v30 = vpop.permute.xlu1 %663 }
 0x46d   :  { %v1793_v46 = vadd.f32 %v1792_v44, %v1701_v45  ;;  %v774_v48 = vpop.f32.mrb[13].mxu1  ;;  %v2330_v44 = vpop.permute.xlu0 %469 }
 0x46e   :  { %v1796_v51 = vadd.f32 %v1795_v47, %v774_v48  ;;  %v1702_v53 = vpop.f32.mrb[14].mxu1 }
 0x46f   :  { %v1505_v2 = vmul.f32 -1.442695, %v1793_v46  ;;  %v1799_v23 = vadd.f32 %v1798_v50, %v1702_v53  ;;  %v777_v25 = vpop.f32.mrb[15].mxu1 }
 0x470   :  { %v1503_v54 = vmul.f32 -1.442695, %v1796_v51  ;;  %v1802_v32 = vadd.f32 %v1801_v55, %v777_v25  ;;  %v2332_v53 = vpop.permute.xlu1 %474 }
 0x471   :  { %1859 = vpow2.f32 %v1505_v2  ;;  %v1506_v41 = vmul.f32 -1.442695, %v1799_v23  ;;  %v2334_v25 = vpop.permute.xlu0 %668 }
 0x472   :  { %1861 = vpow2.f32 %v1503_v54  ;;  %v1504_v29 = vmul.f32 -1.442695, %v1802_v32 }
 0x473   :  { %v1852_v42 = vpop.eup %1851  ;;  %1863 = vpow2.f32 %v1506_v41 }
 0x474   :  { %v1854_v33 = vpop.eup %1853  ;;  %v823_v45 = vadd.f32 1.0, %v1852_v42  ;;  %1865 = vpow2.f32 %v1504_v29  ;;  %v1705_v47 = vpop.f32.mrb[16].mxu1 }
 0x475   :  { %v1856_v38 = vpop.eup %1855  ;;  %v821_v46 = vadd.f32 1.0, %v1854_v33  ;;  %v790_v48 = vpop.f32.mrb[17].mxu1 }
 0x476   :  { %v1858_v50 = vpop.eup %1857  ;;  %1867 = vrcp.f32 %v823_v45  ;;  %v824_v51 = vadd.f32 1.0, %v1856_v38  ;;  %v1706_v55 = vpop.f32.mrb[18].mxu1  ;;  %v799_v45 = vadd.f32 %v1705_v47, %v2334_v25  ;;  %v602_v47 = vadd.f32 %v2296_v26, %v2330_v44 }
 0x477   :  { %1869 = vrcp.f32 %v821_v46  ;;  %v822_v2 = vadd.f32 1.0, %v1858_v50  ;;  %v793_v23 = vpop.f32.mrb[19].mxu1  ;;  %v2336_v41 = vpop.permute.xlu1 %673  ;;  %v791_v50 = vadd.f32 %v790_v48, %v2325_v52 }
 0x478   :  { %1871 = vrcp.f32 %v824_v51  ;;  %2489 = vst [vmem:[#allocation9_spill] sm:$0xff] %v2336_v41  ;;  %v2339_v43 = vpop.permute.xlu0 %479  ;;  %v802_v21 = vadd.f32 %v1706_v55, %v2336_v41  ;;  %v605_v55 = vadd.f32 %v2301_v31, %v2332_v53 }
 0x479   :  { %1873 = vrcp.f32 %v822_v2  ;;  %v610_v2 = vadd.f32 %v2294_v24, %v2339_v43 }
 0x47b   :  { %v1860_v54 = vpop.eup %1859  ;;  %v2345_v19 = vpop.permute.xlu1 %484 }
 0x47c   :  { %v1862_v32 = vpop.eup %1861  ;;  %v851_v42 = vadd.f32 1.0, %v1860_v54  ;;  %v613_v48 = vadd.f32 %v2298_v28, %v2345_v19 }
 0x47d   :  { %v1864_v29 = vpop.eup %1863  ;;  %v849_v22 = vadd.f32 1.0, %v1862_v32 }
 0x47e   :  { %v1866_v33 = vpop.eup %1865  ;;  %v852_v20 = vadd.f32 1.0, %v1864_v29  ;;  %1875 = vrcp.f32 %v851_v42  ;;  %v794_v29 = vadd.f32 %v793_v23, %v2328_v30 }
 0x47f   :  { %v850_v46 = vadd.f32 1.0, %v1866_v33  ;;  %1877 = vrcp.f32 %v849_v22 }
 0x480   :  { %v1868_v38 = vpop.eup %1867  ;;  %1879 = vrcp.f32 %v852_v20 }
 0x481   :  { %v1870_v51 = vpop.eup %1869  ;;  %v863_v40 = vmul.f32 %v1868_v38, %v799_v45  ;;  %1881 = vrcp.f32 %v850_v46 }
 0x482   :  { %v1872_v54 = vpop.eup %1871  ;;  %v861_v32 = vmul.f32 %v1870_v51, %v791_v50 }
 0x483   :  { %v1874_v33 = vpop.eup %1873  ;;  %v867_v24 = vadd.f32 %v863_v40, %v610_v2  ;;  %v864_v42 = vmul.f32 %v1872_v54, %v802_v21 }
 0x484   :  { %v865_v45 = vadd.f32 %v861_v32, %v602_v47  ;;  %v862_v38 = vmul.f32 %v1874_v33, %v794_v29 }
 0x485   :  { %1883 = vtanh.f32 %v867_v24  ;;  %v868_v41 = vadd.f32 %v864_v42, %v613_v48 }
 0x486   :  { %1885 = vtanh.f32 %v865_v45  ;;  %v866_v22 = vadd.f32 %v862_v38, %v605_v55 }
 0x487   :  { %1887 = vtanh.f32 %v868_v41 }
 0x488   :  { %1889 = vtanh.f32 %v866_v22  ;;  %v1876_v26 = vpop.eup %1875 }
 0x489   :  { %v1878_v23 = vpop.eup %1877  ;;  %v875_v28 = vsub.f32 1.0, %v1876_v26  ;;  %v883_v31 = vmul.f32 %v1876_v26, %v2160_v39 }
 0x48a   :  { %v1880_v50 = vpop.eup %1879  ;;  %v873_v40 = vsub.f32 1.0, %v1878_v23  ;;  %v881_v29 = vmul.f32 %v1878_v23, %v2152_v35 }
 0x48b   :  { %v1882_v51 = vpop.eup %1881  ;;  %v876_v2 = vsub.f32 1.0, %v1880_v50  ;;  %v884_v48 = vmul.f32 %v1880_v50, %v2154_v36  ;;  %v1848_v50 = vld [vmem:[%s2473_s4 + $0x18] sm:$0xff]  }
 0x48c   :  { %v874_v47 = vsub.f32 1.0, %v1882_v51  ;;  %v882_v55 = vmul.f32 %v1882_v51, %v2156_v37 }
 0x48f   :  { %v1884_v20 = vpop.eup %1883 }
 0x490   :  { %v1886_v21 = vpop.eup %1885  ;;  %v879_v54 = vmul.f32 %v1884_v20, %v875_v28 }
 0x491   :  { %v1888_v46 = vpop.eup %1887  ;;  %v877_v32 = vmul.f32 %v1886_v21, %v873_v40 }
 0x492   :  { %v1890_v33 = vpop.eup %1889  ;;  %v880_v41 = vmul.f32 %v1888_v46, %v876_v2  ;;  %v2357_v24 = vadd.f32 %v883_v31, %v879_v54 }
 0x493   :  { %v878_v42 = vmul.f32 %v1890_v33, %v874_v47  ;;  %v2360_v45 = vadd.f32 %v881_v29, %v877_v32  ;;  %v2493_v33 = vld [vmem:[#allocation8_spill] sm:$0xff] }
 0x494   :  { %v2362_v38 = vadd.f32 %v884_v48, %v880_v41 }
 0x495   :  { %v2364_v22 = vadd.f32 %v882_v55, %v878_v42  ;;  %v2494_v55 = vld [vmem:[#allocation4_spill] sm:$0xff] }
 0x496   :  { %v895_v23 = vpack.c.bf16 %v2362_v38, %v2357_v24 }
 0x497   :  { %v894_v26 = vpack.c.bf16 %v2364_v22, %v2360_v45 }
 0x499   :  { %1707 = vmatprep.subr.bf16.mxu0 %v894_v26 }
 0x49a   :  { %1708 = vmatpush3.bf16.msra.mxu0 %v894_v26 }
 0x49b   :  { %1709 = vmatprep.subr.bf16.mxu0 %v895_v23 }
 0x49e   :  { %1710 = vmatpush3.bf16.msra.mxu0 %v895_v23 }
 0x49f   :  { %1715 = vmatprep.subr.bf16.mxu0 %v1993_v6 }
 0x4a1   :  { %1712 = vmatmul.mubr.msk.bf16.vlgmr.msra.gmra.mrb[20].mxu0 %vm318_vm2, %v1848_v50 }
 0x4a2   :  { %1716 = vmatpush3.bf16.msra.mxu0 %v1993_v6 }
 0x4a3   :  { %1717 = vmatprep.subr.bf16.mxu0 %v1995_v7 }
 0x4a6   :  { %1718 = vmatpush3.bf16.msra.mxu0 %v1995_v7 }
 0x4a7   :  { %1719 = vmatprep.subr.bf16.mxu0 %v2003_v9 }
 0x4aa   :  { %1720 = vmatpush3.bf16.msra.mxu0 %v2003_v9 }
 0x4ab   :  { %1721 = vmatprep.subr.bf16.mxu0 %v2007_v10 }
 0x4ae   :  { %1722 = vmatpush3.bf16.msra.mxu0 %v2007_v10 }
 0x4af   :  { %1723 = vmatprep.subr.bf16.mxu0 %v2014_v12 }
 0x4b2   :  { %1724 = vmatpush3.bf16.msra.mxu0 %v2014_v12 }
 0x4b3   :  { %1725 = vmatprep.subr.bf16.mxu0 %v2018_v13 }
 0x4b6   :  { %1726 = vmatpush3.bf16.msra.mxu0 %v2018_v13 }
 0x4b7   :  { %1727 = vmatprep.subr.bf16.mxu0 %v2026_v15 }
 0x4ba   :  { %1728 = vmatpush3.bf16.msra.mxu0 %v2026_v15  ;;  %v1849_v15 = vld [vmem:[%s2473_s4 + $0x20] sm:$0xff]  }
 0x4bb   :  { %1729 = vmatprep.subr.bf16.mxu0 %v2030_v16 }
 0x4be   :  { %1730 = vmatpush3.bf16.msra.mxu0 %v2030_v16 }
 0x574   :  { %v1713_v6 = vpop.f32.mrb[20].mxu0 }
 0x575   :  { %v946_v7 = vpop.f32.mrb[21].mxu0 }
 0x576   :  { %v1714_v9 = vpop.f32.mrb[22].mxu0 }
 0x577   :  { %v962_v10 = vpack.c.bf16 %v1714_v9, %v1713_v6  ;;  %v949_v51 = vpop.f32.mrb[23].mxu0 }
 0x578   :  { %v961_v28 = vpack.c.bf16 %v949_v51, %v946_v7 }
 0x57a   :  { %1731 = vmatprep.mubr.bf16.mxu0 %v961_v28 }
 0x57b   :  { %1732 = vmatmul.mubr.bf16.vlgmr.msra.gmra.mrb[24].mxu0 %v962_v10 }
 0x57c   :  { %1771 = vmatprep.mubr.msk.bf16.mxu0 %vm318_vm2, %v1849_v15 }
 0x64e   :  { %v1733_v12 = vpop.f32.mrb[24].mxu0 }
 0x64f   :  { %v997_v20 = vpop.f32.mrb[25].mxu0 }
 0x650   :  { %v1734_v40 = vpop.f32.mrb[26].mxu0 }
 0x651   :  { %v1013_v13 = vpack.c.bf16 %v1734_v40, %v1733_v12  ;;  %v1000_v21 = vpop.f32.mrb[27].mxu0 }
 0x652   :  { %v1012_v2 = vpack.c.bf16 %v1000_v21, %v997_v20 }
 0x654   :  { %1735 = vmatprep.subr.bf16.mxu1 %v1012_v2 }
 0x655   :  { %1736 = vmatpush3.bf16.msra.mxu1 %v1012_v2 }
 0x656   :  { %1737 = vmatprep.subr.bf16.mxu1 %v1013_v13 }
 0x659   :  { %1738 = vmatpush3.bf16.msra.mxu1 %v1013_v13 }
 0x65a   :  { %1751 = vmatprep.subr.bf16.mxu1 %v894_v26 }
 0x65c   :  { %1740 = vmatmul.mubr.msk.bf16.vlgmr.msra.gmra.mrb[20].mxu1 %vm318_vm2, %v2198_v56 }
 0x65d   :  { %1752 = vmatpush3.bf16.msra.mxu1 %v894_v26  ;;  %1743 = vmatprep.mubr.msk.bf16.mxu1 %vm318_vm2, %v2208_v58  ;;  %v1803_v58 = vadd.f32 %v2282_v17, %v2278_v11  ;;  %v2491_v17 = vld [vmem:[#allocation5_spill] sm:$0xff]  ;;  %v2495_v26 = vld [vmem:[#allocation6_spill] sm:$0xff] }
 0x65e   :  { %1753 = vmatprep.subr.bf16.mxu1 %v895_v23 }
 0x661   :  { %1754 = vmatpush3.bf16.msra.mxu1 %v895_v23  ;;  %v1817_v23 = vadd.f32 %v2495_v26, %v2494_v55 }
 0x664   :  { %1744 = vmatmul.mubr.msk.bf16.gmra.mrb[24].mxu1 %vm318_vm2, %v2226_v60 }
 0x665   :  { %1747 = vmatprep.mubr.msk.bf16.mxu1 %vm318_vm2, %v2190_v49 }
 0x66c   :  { %1748 = vmatmul.mubr.msk.bf16.gmra.mrb[28].mxu1 %vm318_vm2, %v2203_v57 }
 0x66d   :  { %1755 = vmatprep.mubr.msk.bf16.mxu1 %vm318_vm2, %v2213_v59  ;;  %v1805_v59 = vadd.f32 %v2274_v5, %v2270_v3  ;;  %v1811_v5 = vadd.f32 %v2315_v27, %v2305_v34 }
 0x674   :  { %1756 = vmatmul.mubr.msk.bf16.vlgmr.msra.gmra.mrb[20].mxu1 %vm318_vm2, %v2231_v61  ;;  %v1807_v61 = vadd.f32 %v2284_v18, %v2280_v14  ;;  %v2490_v14 = vld [vmem:[#allocation3_spill] sm:$0xff] }
 0x675   :  { %1759 = vmatprep.mubr.msk.bf16.mxu1 %vm318_vm2, %v2236_v62  ;;  %v1813_v18 = vadd.f32 %v2491_v17, %v2490_v14 }
 0x67c   :  { %1760 = vmatmul.mubr.msk.bf16.gmra.mrb[24].mxu1 %vm318_vm2, %v2247_v63 }
 0x67d   :  { %1763 = vmatprep.mubr.msk.bf16.mxu1 %vm318_vm2, %v2252_v0  ;;  %v1809_v0 = vadd.f32 %v2276_v8, %v2272_v4  ;;  %v2492_v8 = vld [vmem:[#allocation7_spill] sm:$0xff] }
 0x67e   :  { %v1815_v41 = vadd.f32 %v2493_v33, %v2492_v8 }
 0x684   :  { %1764 = vmatmul.mubr.msk.bf16.gmra.mrb[32].mxu1 %vm318_vm2, %v2261_v1 }
 0x73f   :  { %v2416_v16 = vpop.f32.mrb[28].mxu1 }
 0x740   :  { %v2418_v49 = vpop.f32.mrb[29].mxu1  ;;  %v1089_v14 = vadd.f32 %v2416_v16, %v2339_v43 }
 0x741   :  { %v2420_v56 = vpop.f32.mrb[30].mxu1  ;;  %v1081_v33 = vadd.f32 %v2418_v49, %v2330_v44 }
 0x742   :  { %v2422_v57 = vpop.f32.mrb[31].mxu1 }
 0x743   :  { %v1084_v43 = vadd.f32 %v2422_v57, %v2332_v53 }
 0x747   :  { %v1757_v60 = vpop.f32.mrb[20].mxu1 }
 0x748   :  { %v1804_v62 = vadd.f32 %v1803_v58, %v1757_v60  ;;  %v1129_v63 = vpop.f32.mrb[21].mxu1 }
 0x749   :  { %v1806_v1 = vadd.f32 %v1805_v59, %v1129_v63  ;;  %v1758_v54 = vpop.f32.mrb[22].mxu1 }
 0x74a   :  { %v1529_v31 = vmul.f32 -1.442695, %v1804_v62  ;;  %v1808_v46 = vadd.f32 %v1807_v61, %v1758_v54  ;;  %v1132_v47 = vpop.f32.mrb[23].mxu1 }
 0x74b   :  { %v1527_v32 = vmul.f32 -1.442695, %v1806_v1  ;;  %v1810_v29 = vadd.f32 %v1809_v0, %v1132_v47 }
 0x74c   :  { %1891 = vpow2.f32 %v1529_v31  ;;  %v1530_v11 = vmul.f32 -1.442695, %v1808_v46 }
 0x74d   :  { %1893 = vpow2.f32 %v1527_v32  ;;  %v1528_v3 = vmul.f32 -1.442695, %v1810_v29 }
 0x74e   :  { %1895 = vpow2.f32 %v1530_v11 }
 0x74f   :  { %1897 = vpow2.f32 %v1528_v3  ;;  %v1761_v4 = vpop.f32.mrb[24].mxu1 }
 0x750   :  { %v1812_v48 = vadd.f32 %v1811_v5, %v1761_v4  ;;  %v1145_v42 = vpop.f32.mrb[25].mxu1 }
 0x751   :  { %v1814_v50 = vadd.f32 %v1813_v18, %v1145_v42  ;;  %v1762_v6 = vpop.f32.mrb[26].mxu1  ;;  %v2496_v18 = vld [vmem:[#allocation9_spill] sm:$0xff] }
 0x752   :  { %v1533_v7 = vmul.f32 -1.442695, %v1812_v48  ;;  %v1816_v9 = vadd.f32 %v1815_v41, %v1762_v6  ;;  %v1148_v10 = vpop.f32.mrb[27].mxu1 }
 0x753   :  { %v1531_v34 = vmul.f32 -1.442695, %v1814_v50  ;;  %v1818_v27 = vadd.f32 %v1817_v23, %v1148_v10 }
 0x754   :  { %1899 = vpow2.f32 %v1533_v7  ;;  %v1534_v51 = vmul.f32 -1.442695, %v1816_v9 }
 0x755   :  { %1901 = vpow2.f32 %v1531_v34  ;;  %v1532_v28 = vmul.f32 -1.442695, %v1818_v27 }
 0x756   :  { %v1892_v12 = vpop.eup %1891  ;;  %1903 = vpow2.f32 %v1534_v51 }
 0x757   :  { %v1894_v20 = vpop.eup %1893  ;;  %v1194_v40 = vadd.f32 1.0, %v1892_v12  ;;  %1905 = vpow2.f32 %v1532_v28  ;;  %v1765_v13 = vpop.f32.mrb[32].mxu1 }
 0x758   :  { %v1896_v21 = vpop.eup %1895  ;;  %v1192_v2 = vadd.f32 1.0, %v1894_v20  ;;  %v1161_v15 = vpop.f32.mrb[33].mxu1  ;;  %v1170_v32 = vadd.f32 %v1765_v13, %v2334_v25 }
 0x759   :  { %v1898_v58 = vpop.eup %1897  ;;  %1907 = vrcp.f32 %v1194_v40  ;;  %v1195_v59 = vadd.f32 1.0, %v1896_v21  ;;  %v1766_v60 = vpop.f32.mrb[34].mxu1  ;;  %v1162_v3 = vadd.f32 %v1161_v15, %v2325_v52  ;;  %v1092_v52 = vadd.f32 %v2420_v56, %v2345_v19 }
 0x75a   :  { %1909 = vrcp.f32 %v1192_v2  ;;  %v1193_v61 = vadd.f32 1.0, %v1898_v58  ;;  %v1164_v62 = vpop.f32.mrb[35].mxu1  ;;  %v1173_v4 = vadd.f32 %v1766_v60, %v2496_v18 }
 0x75b   :  { %1911 = vrcp.f32 %v1195_v59  ;;  %v1165_v25 = vadd.f32 %v1164_v62, %v2328_v30 }
 0x75c   :  { %1913 = vrcp.f32 %v1193_v61 }
 0x75e   :  { %v1900_v63 = vpop.eup %1899 }
 0x75f   :  { %v1902_v0 = vpop.eup %1901  ;;  %v1222_v54 = vadd.f32 1.0, %v1900_v63 }
 0x760   :  { %v1904_v1 = vpop.eup %1903  ;;  %v1220_v46 = vadd.f32 1.0, %v1902_v0 }
 0x761   :  { %v1906_v31 = vpop.eup %1905  ;;  %v1223_v47 = vadd.f32 1.0, %v1904_v1  ;;  %1915 = vrcp.f32 %v1222_v54 }
 0x762   :  { %v1221_v11 = vadd.f32 1.0, %v1906_v31  ;;  %1917 = vrcp.f32 %v1220_v46 }
 0x763   :  { %v1908_v29 = vpop.eup %1907  ;;  %1919 = vrcp.f32 %v1223_v47 }
 0x764   :  { %v1910_v5 = vpop.eup %1909  ;;  %v1234_v17 = vmul.f32 %v1908_v29, %v1170_v32  ;;  %1921 = vrcp.f32 %v1221_v11  ;;  %v1850_v32 = vld [vmem:[%s2473_s4 + $0x28] sm:$0xff]   ;;  %v1286_v29 = vpop.permute.xlu0 %1285 }
 0x765   :  { %v1912_v8 = vpop.eup %1911  ;;  %v1232_v41 = vmul.f32 %v1910_v5, %v1162_v3 }
 0x766   :  { %v1914_v48 = vpop.eup %1913  ;;  %v1238_v42 = vadd.f32 %v1234_v17, %v1089_v14  ;;  %v1235_v55 = vmul.f32 %v1912_v8, %v1173_v4 }
 0x767   :  { %v1236_v16 = vadd.f32 %v1232_v41, %v1081_v33  ;;  %v1233_v26 = vmul.f32 %v1914_v48, %v1165_v25 }
 0x768   :  { %1923 = vtanh.f32 %v1238_v42  ;;  %v1239_v23 = vadd.f32 %v1235_v55, %v1092_v52  ;;  %v1296_v11 = vpop.permute.xlu0 %1295 }
 0x769   :  { %1925 = vtanh.f32 %v1236_v16  ;;  %v1237_v44 = vadd.f32 %v1233_v26, %v1084_v43 }
 0x76a   :  { %1927 = vtanh.f32 %v1239_v23 }
 0x76b   :  { %1929 = vtanh.f32 %v1237_v44  ;;  %v1916_v30 = vpop.eup %1915 }
 0x76c   :  { %v1918_v49 = vpop.eup %1917  ;;  %v1246_v19 = vsub.f32 1.0, %v1916_v30  ;;  %v1254_v53 = vmul.f32 %v1916_v30, %v2357_v24  ;;  %v1383_v4 = vpop.permute.xlu0 %1382 }
 0x76d   :  { %v1920_v50 = vpop.eup %1919  ;;  %v1244_v7 = vsub.f32 1.0, %v1918_v49  ;;  %v1252_v28 = vmul.f32 %v1918_v49, %v2360_v45 }
 0x76e   :  { %v1922_v6 = vpop.eup %1921  ;;  %v1247_v10 = vsub.f32 1.0, %v1920_v50  ;;  %v1255_v40 = vmul.f32 %v1920_v50, %v2362_v38 }
 0x76f   :  { %v1245_v27 = vsub.f32 1.0, %v1922_v6  ;;  %v1253_v2 = vmul.f32 %v1922_v6, %v2364_v22 }
 0x770   :  { %v1393_v23 = vpop.permute.xlu0 %1392 }
 0x772   :  { %v1924_v56 = vpop.eup %1923 }
 0x773   :  { %v1926_v9 = vpop.eup %1925  ;;  %v1250_v34 = vmul.f32 %v1924_v56, %v1246_v19 }
 0x774   :  { %v1928_v57 = vpop.eup %1927  ;;  %v1248_v51 = vmul.f32 %v1926_v9, %v1244_v7 }
 0x775   :  { %v1930_v12 = vpop.eup %1929  ;;  %v1251_v20 = vmul.f32 %v1928_v57, %v1247_v10  ;;  %v1258_v13 = vadd.f32 %v1254_v53, %v1250_v34 }
 0x776   :  { %v1249_v21 = vmul.f32 %v1930_v12, %v1245_v27  ;;  %v1256_v15 = vadd.f32 %v1252_v28, %v1248_v51  ;;  %v1416_v27 = vpop.permute.xlu0 %1415 }
 0x777   :  { %v1259_v58 = vadd.f32 %v1255_v40, %v1251_v20  ;;  %vm1262_vm7 = vcmp.gt.f32.partialorder %v1258_v13, 0.0  ;;  %v1266_v59 = vmul.f32 0.01, %v1258_v13 }
 0x778   :  { %v1257_v60 = vadd.f32 %v1253_v2, %v1249_v21  ;;  %vm1260_vm8 = vcmp.gt.f32.partialorder %v1256_v15, 0.0  ;;  %v1264_v24 = vmul.f32 0.01, %v1256_v15 }
 0x779   :  { %vm1263_vm9 = vcmp.gt.f32.partialorder %v1259_v58, 0.0  ;;  %v1267_v61 = vmul.f32 0.01, %v1259_v58  ;;  %v1270_v62 = vsel %vm1262_vm7, %v1258_v13, %v1266_v59 }
 0x77a   :  { %vm1261_vm10 = vcmp.gt.f32.partialorder %v1257_v60, 0.0  ;;  %v1265_v45 = vmul.f32 0.01, %v1257_v60  ;;  %v1268_v63 = vsel %vm1260_vm8, %v1256_v15, %v1264_v24  ;;  %v1274_v38 = vadd.f32 %v1270_v62, %v2160_v39  ;;  %v1291_v39 = vpop.permute.xlu1 %1290 }
 0x77b   :  { %v1271_v0 = vsel %vm1263_vm9, %v1259_v58, %v1267_v61  ;;  %v1272_v22 = vadd.f32 %v1268_v63, %v2152_v35 }
 0x77c   :  { %v1269_v1 = vsel %vm1261_vm10, %v1257_v60, %v1265_v45  ;;  %v1275_v54 = vadd.f32 %v1271_v0, %v2154_v36 }
 0x77d   :  { %v1273_v31 = vadd.f32 %v1269_v1, %v2156_v37 }
 0x77e   :  { %v1282_v46 = vpack.c.bf16 %v1275_v54, %v1274_v38  ;;  %v1301_v36 = vpop.permute.xlu1 %1300 }
 0x77f   :  { %v1281_v47 = vpack.c.bf16 %v1273_v31, %v1272_v22 }
 0x781   :  { %1767 = vmatprep.subr.bf16.mxu0 %v1281_v47 }
 0x782   :  { %1768 = vmatpush3.bf16.msra.mxu0 %v1281_v47  ;;  %v1388_v25 = vpop.permute.xlu1 %1387 }
 0x783   :  { %1769 = vmatprep.subr.bf16.mxu0 %v1282_v46 }
 0x786   :  { %1770 = vmatpush3.bf16.msra.mxu0 %v1282_v46  ;;  %v1398_v50 = vpop.permute.xlu1 %1397 }
 0x789   :  { %1772 = vmatmul.mubr.msk.bf16.vlgmr.msra.gmra.mrb[28].mxu0 %vm318_vm2, %v1850_v32 }
 0x85c   :  { %v1773_v3 = vpop.f32.mrb[28].mxu0 }
 0x85d   :  { %v1362_v35 = vadd.f32 %v1773_v3, %v1296_v11  ;;  %v1353_v5 = vpop.f32.mrb[29].mxu0 }
 0x85e   :  { %v1354_v37 = vadd.f32 %v1353_v5, %v1286_v29  ;;  %v1774_v14 = vpop.f32.mrb[30].mxu0 }
 0x85f   :  { %v1365_v17 = vadd.f32 %v1774_v14, %v1301_v36  ;;  %v1356_v18 = vpop.f32.mrb[31].mxu0  ;;  %v1374_v8 = vmul.f32 0.01, %v1362_v35  ;;  %vm1370_vm12 = vcmp.gt.f32.partialorder %v1362_v35, 0.0 }
 0x860   :  { %vm1368_vm11 = vcmp.gt.f32.partialorder %v1354_v37, 0.0  ;;  %v1372_v33 = vmul.f32 0.01, %v1354_v37  ;;  %v1357_v41 = vadd.f32 %v1356_v18, %v1291_v39 }
 0x861   :  { %v1375_v52 = vmul.f32 0.01, %v1365_v17  ;;  %vm1371_vm14 = vcmp.gt.f32.partialorder %v1365_v17, 0.0  ;;  %v1378_v55 = vsel %vm1370_vm12, %v1362_v35, %v1374_v8 }
 0x862   :  { %v1376_v48 = vsel %vm1368_vm11, %v1354_v37, %v1372_v33  ;;  %vm1369_vm13 = vcmp.gt.f32.partialorder %v1357_v41, 0.0  ;;  %v1373_v42 = vmul.f32 0.01, %v1357_v41  ;;  %v1402_v30 = vmul.f32 %v1393_v23, %v1378_v55 }
 0x863   :  { %v1400_v16 = vmul.f32 %v1383_v4, %v1376_v48  ;;  %v1379_v44 = vsel %vm1371_vm14, %v1365_v17, %v1375_v52 }
 0x864   :  { %v1377_v43 = vsel %vm1369_vm13, %v1357_v41, %v1373_v42  ;;  %v1403_v6 = vmul.f32 %v1398_v50, %v1379_v44 }
 0x865   :  { %v1401_v26 = vmul.f32 %v1388_v25, %v1377_v43 }
 0x867   :  { %v1404_v49 = vadd.f32 %v1401_v26, %v1400_v16 }
 0x869   :  { %v1405_v19 = vadd.f32 %v1404_v49, %v1402_v30 }
 0x86b   :  { %v1406_v56 = vadd.f32 %v1405_v19, %v1403_v6 }
 0x86d   :  { %v1407_v7 = vrot.slane %v1406_v56, 4 }
 0x86f   :  { %v1408_v9 = vadd.f32 %v1407_v7, %v1406_v56 }
 0x871   :  { %v1409_v10 = vrot.slane %v1408_v9, 2 }
 0x873   :  { %v1410_v34 = vadd.f32 %v1409_v10, %v1408_v9 }
 0x875   :  { %v1411_v53 = vrot.slane %v1410_v34, 1 }
 0x877   :  { %v1412_v57 = vadd.f32 %v1411_v53, %v1410_v34 }
 0x879   :  { %v1418_v51 = vadd.f32 %v1416_v27, %v1412_v57 }
 0x87b   :  { %vm1419_vm15 = vcmp.gt.f32.partialorder %v1418_v51, 0.0  ;;  %v1420_v28 = vmul.f32 0.01, %v1418_v51 }
 0x87d   :  { %v1421_v12 = vsel %vm1419_vm15, %v1418_v51, %v1420_v28 }
 0x87e   :  { %v1543_v20 = vmul.f32 -1.442695, %v1421_v12 }
 0x880   :  { %1931 = vpow2.f32 %v1543_v20 }
 0x88a   :  { %v1932_v40 = vpop.eup %1931 }
 0x88b   :  { %v1425_v13 = vadd.f32 1.0, %v1932_v40 }
 0x88d   :  { %1933 = vrcp.f32 %v1425_v13 }
 0x897   :  { %v1934_v21 = vpop.eup %1933 }
 0x898   :  { %1428 = vst [vmem:[%s2475_s8] sm:$0x1] %v1934_v21 }

</bundles_post_ra>
